<compile_context>
chip_gen: v7x
topology: tpu7x:2x2x1
jax: 0.10.0
libtpu: 0.0.40
codegen_flags: <defaults>
</compile_context>

<pallas_src>
import jax
import jax.numpy as jnp
import numpy as np
from jax.experimental import pallas as pl
from jax.experimental.pallas import tpu as pltpu

_EPS = 1e-5  # nn.BatchNorm2d default eps


# ----------------------------------------------------------------------------
# Fused ResBlock kernel (closure over the static shape).
# ----------------------------------------------------------------------------
def _make_resblock_kernel(n_img, h, hp, w, c):
    wc = w * c
    rows = n_img * hp
    inv_cnt = 1.0 / float(n_img * h * w)   # elements per channel for BN stats

    def kernel(x_ref, w_ref, bn_ref, o_ref, h_ref):
        # x_ref : (N*Hp, W*C)     bf16  H-padded, 8-row-aligned input slab
        # w_ref : (2, 3, WC, WC)  bf16  block-tridiagonal row weights [layer, dy]
        # bn_ref: (4, WC)         f32   [gamma1, beta1, gamma2, beta2] tiled over W
        # o_ref : (N*Hp, WC)      f32   output slab (padding rows forced to 0)
        # h_ref : (N*Hp, WC)      bf16  VMEM scratch for the hidden slab

        # Per-row validity: rows 1..H inside each Hp-row image block are real;
        # row 0 is the top conv pad, rows H+1..Hp-1 are bottom/alignment pads.
        rid = jax.lax.broadcasted_iota(jnp.int32, (rows, wc), 0) % hp
        valid = jnp.logical_and(rid >= 1, rid <= h)

        zrow = jnp.zeros((1, wc), jnp.float32)

        def conv_slab(src, layer):
            """3x3 'same' conv of the whole padded slab -> masked f32 slab."""
            y0 = jnp.dot(src, w_ref[layer, 0], preferred_element_type=jnp.float32)
            y1 = jnp.dot(src, w_ref[layer, 1], preferred_element_type=jnp.float32)
            y2 = jnp.dot(src, w_ref[layer, 2], preferred_element_type=jnp.float32)
            # out[m] = Y0[m-1] + Y1[m] + Y2[m+1]; shifts handled on the results
            # (aligned matmul inputs), cross-image rows are killed by `valid`.
            acc = (y1
                   + jnp.concatenate([zrow, y0[:-1, :]], axis=0)   # dy = 0 tap
                   + jnp.concatenate([y2[1:, :], zrow], axis=0))   # dy = 2 tap
            return jnp.where(valid, acc, 0.0)

        def group_sum(v):
            """Sum a (1, WC) row over the W lane-groups (stride C) and broadcast
            the per-channel result back to every group — lane rotations only."""
            out = v
            for k in range(1, w):
                out = out + pltpu.roll(v, k * c, axis=1)
            return out

        def bn_scale_shift(y_masked, gamma, beta):
            """Training-mode BN over the whole batch as per-lane scale/shift."""
            s1 = group_sum(jnp.sum(y_masked, axis=0, keepdims=True))
            s2 = group_sum(jnp.sum(y_masked * y_masked, axis=0, keepdims=True))
            mean = s1 * inv_cnt
            var = s2 * inv_cnt - mean * mean
            scale = gamma * jax.lax.rsqrt(var + _EPS)
            shift = beta - mean * scale
            return scale, shift

        xv = x_ref[...]                                  # bf16 slab (residual too)

        # --- conv1 -> bn1 -> relu, padding rows forced to exact zeros --------
        y1m = conv_slab(xv, 0)
        sc1, sh1 = bn_scale_shift(y1m, bn_ref[0:1, :], bn_ref[1:2, :])
        hid = jnp.where(valid, jnp.maximum(y1m * sc1 + sh1, 0.0), 0.0)
        h_ref[...] = hid.astype(jnp.bfloat16)

        # --- conv2 -> bn2 -> +residual -> relu, single lane-dense store ------
        y2m = conv_slab(h_ref[...], 1)
        sc2, sh2 = bn_scale_shift(y2m, bn_ref[2:3, :], bn_ref[3:4, :])
        res = xv.astype(jnp.float32)
        o_ref[...] = jnp.where(valid,
                               jnp.maximum(y2m * sc2 + sh2 + res, 0.0), 0.0)

    return kernel


# ----------------------------------------------------------------------------
# Parameter packing (hoisted: run once per parameter update, not per forward).
# ----------------------------------------------------------------------------
def _row_conv_weights(w_hwio, w):
    """(3, 3, C, C) HWIO -> (3, W*C, W*C) block-tridiagonal row-matmul weights.

    Wrow[dy][wi*C + ci, wo*C + co] = w_hwio[dy, dx, ci, co] with dx = wi-wo+1,
    zero when wi falls outside [0, W) — this folds the W-direction zero padding
    of the "same" conv directly into the weights.
    """
    c = w_hwio.shape[2]
    per_dy = []
    for dy in range(3):
        blk = jnp.zeros((w * c, w * c), jnp.float32)
        for dx in range(3):
            shift = jnp.eye(w, k=1 - dx, dtype=jnp.float32)
            blk = blk + jnp.kron(shift, w_hwio[dy, dx].astype(jnp.float32))
        per_dy.append(blk)
    return jnp.stack(per_dy)


def pack_resblock_params(params, w):
    w_big = jnp.stack([_row_conv_weights(params["w1"], w),
                       _row_conv_weights(params["w2"], w)]).astype(jnp.bfloat16)
    bn = jnp.stack([jnp.tile(params["g1"].astype(jnp.float32), w),
                    jnp.tile(params["be1"].astype(jnp.float32), w),
                    jnp.tile(params["g2"].astype(jnp.float32), w),
                    jnp.tile(params["be2"].astype(jnp.float32), w)])   # (4, WC)
    # Conv biases b1/b2 are intentionally NOT packed: batch-statistic BN
    # subtracts the per-channel mean, which cancels a per-channel constant.
    return {"w_big": w_big, "bn": bn}


# ----------------------------------------------------------------------------
# ResBlock forward (NCHW in / NCHW out, matching the PyTorch module).
# ----------------------------------------------------------------------------
@jax.jit
def resblock_forward(x_nchw, packed):
    x = jnp.transpose(x_nchw, (0, 2, 3, 1)).astype(jnp.float32)   # -> NHWC
    n, h, w, c = x.shape
    wc = w * c
    hp = ((h + 2 + 7) // 8) * 8          # 8-aligned padded rows per image
    rows = n * hp

    # Lane-dense row slab: zero pad only in H (W padding lives in the weights);
    # rows padded to a multiple of 8 so every access is (8,128)-tile aligned.
    x_rows = jnp.pad(x, ((0, 0), (1, hp - h - 1), (0, 0), (0, 0)))
    x_rows = x_rows.reshape(rows, wc).astype(jnp.bfloat16)

    out_rows = pl.pallas_call(
        _make_resblock_kernel(n, h, hp, w, c),
        out_shape=jax.ShapeDtypeStruct((rows, wc), jnp.float32),
        grid_spec=pltpu.PrefetchScalarGridSpec(
            num_scalar_prefetch=0,
            grid=(1,),
            in_specs=[
                pl.BlockSpec((rows, wc), lambda i: (0, 0)),
                pl.BlockSpec((2, 3, wc, wc), lambda i: (0, 0, 0, 0)),
                pl.BlockSpec((4, wc), lambda i: (0, 0)),
            ],
            out_specs=pl.BlockSpec((rows, wc), lambda i: (0, 0)),
            scratch_shapes=[pltpu.VMEM((rows, wc), jnp.bfloat16)],
        ),
        compiler_params=pltpu.CompilerParams(
            dimension_semantics=("arbitrary",)),
    )(x_rows, packed["w_big"], packed["bn"])

    out = out_rows.reshape(n, hp, w, c)[:, 1:h + 1]                # drop pads
    return jnp.transpose(out, (0, 3, 1, 2))                        # -> NCHW


# ----------------------------------------------------------------------------
# Pure-JAX f32 reference (keeps the conv biases; outputs must still match).
# ----------------------------------------------------------------------------
def ref_resblock(x_nchw, params):
    x = jnp.transpose(x_nchw, (0, 2, 3, 1)).astype(jnp.float32)
    c = x.shape[-1]

    def conv(inp, w_hwio, b):
        y = jax.lax.conv_general_dilated(
            inp, w_hwio, (1, 1), [(1, 1), (1, 1)],
            dimension_numbers=("NHWC", "HWIO", "NHWC"))
        return y + b.reshape(1, 1, 1, c)

    def bn(y, g, be):
        mean = jnp.mean(y, axis=(0, 1, 2), keepdims=True)
        var = jnp.mean((y - mean) ** 2, axis=(0, 1, 2), keepdims=True)
        return (y - mean) * g.reshape(1, 1, 1, c) / jnp.sqrt(var + _EPS) \
            + be.reshape(1, 1, 1, c)

    hid = jax.nn.relu(bn(conv(x, params["w1"], params["b1"]),
                         params["g1"], params["be1"]))
    z = bn(conv(hid, params["w2"], params["b2"]),
           params["g2"], params["be2"]) + x
    return jnp.transpose(jax.nn.relu(z), (0, 3, 1, 2))


if __name__ == "__main__":
    # Shapes consistent with ResBlock(num_hidden=32) on an 8x8 board.
    N, C, H, W = 2, 32, 8, 8

    key = jax.random.PRNGKey(0)
    keys = jax.random.split(key, 9)
    x = jax.random.normal(keys[0], (N, C, H, W), jnp.float32)

    fan_in = C * 3 * 3
    params = {
        # conv weights stored in HWIO layout (kh, kw, in, out)
        "w1": jax.random.normal(keys[1], (3, 3, C, C), jnp.float32) / np.sqrt(fan_in),
        "b1": 0.1 * jax.random.normal(keys[2], (C,), jnp.float32),
        "w2": jax.random.normal(keys[3], (3, 3, C, C), jnp.float32) / np.sqrt(fan_in),
        "b2": 0.1 * jax.random.normal(keys[4], (C,), jnp.float32),
        # BatchNorm affine params
        "g1": 1.0 + 0.1 * jax.random.normal(keys[5], (C,), jnp.float32),
        "be1": 0.1 * jax.random.normal(keys[6], (C,), jnp.float32),
        "g2": 1.0 + 0.1 * jax.random.normal(keys[7], (C,), jnp.float32),
        "be2": 0.1 * jax.random.normal(keys[8], (C,), jnp.float32),
    }

    packed = pack_resblock_params(params, W)    # packing hoisted out of forward

    out = jax.block_until_ready(resblock_forward(x, packed))
    ref = jax.block_until_ready(ref_resblock(x, params))
    # Tolerance loosened vs f32-only path: activations/weights travel as bf16
    # (matmul accumulation and BN statistics remain f32).
    np.testing.assert_allclose(np.asarray(out), np.asarray(ref),
                               rtol=3e-2, atol=3e-2)

    print("KERNEL_OK")
</pallas_src>

<mosaic_0001>
module attributes {stable_mosaic.version = 11 : i64} {
  func.func @kernel(%arg0: i32, %arg1: memref<32x256xbf16, #tpu.memory_space<vmem>>, %arg2: memref<2x3x256x256xbf16, #tpu.memory_space<vmem>>, %arg3: memref<4x256xf32, #tpu.memory_space<vmem>>, %arg4: memref<32x256xf32, #tpu.memory_space<vmem>>, %arg5: memref<32x256xbf16, #tpu.memory_space<vmem>>) attributes {dimension_semantics = [#tpu.dimension_semantics<arbitrary>], iteration_bounds = array<i64: 1>, scalar_prefetch = 0 : i64, scratch_operands = 1 : i64, tpu.core_type = #tpu.core_type<tc>, window_params = [{pipeline_mode = #tpu.pipeline_mode<synchronous>, transform_indices = @transform_0, window_bounds = array<i64: 32, 256>}, {pipeline_mode = #tpu.pipeline_mode<synchronous>, transform_indices = @transform_1, window_bounds = array<i64: 2, 3, 256, 256>}, {pipeline_mode = #tpu.pipeline_mode<synchronous>, transform_indices = @transform_2, window_bounds = array<i64: 4, 256>}, {pipeline_mode = #tpu.pipeline_mode<synchronous>, transform_indices = @transform_3, window_bounds = array<i64: 32, 256>}]} {
    %0 = tpu.iota {dimensions = array<i32: 0>} : vector<32x256xi32>
    %c16_i32 = arith.constant 16 : i32
    %c0_i32 = arith.constant 0 : i32
    %1 = arith.cmpi eq, %c16_i32, %c0_i32 : i32
    %c1_i32 = arith.constant 1 : i32
    %2 = arith.select %1, %c1_i32, %c16_i32 : i32
    %3 = vector.broadcast %2 : i32 to vector<32x256xi32>
    %4 = arith.remsi %0, %3 : vector<32x256xi32>
    %c0_i32_0 = arith.constant 0 : i32
    %5 = vector.broadcast %c0_i32_0 : i32 to vector<32x256xi32>
    %6 = arith.cmpi ne, %4, %5 : vector<32x256xi32>
    %c0_i32_1 = arith.constant 0 : i32
    %7 = vector.broadcast %c0_i32_1 : i32 to vector<32x256xi32>
    %8 = arith.cmpi slt, %4, %7 : vector<32x256xi32>
    %c0_i32_2 = arith.constant 0 : i32
    %9 = arith.cmpi slt, %2, %c0_i32_2 : i32
    %10 = vector.broadcast %9 : i1 to vector<32x256xi1>
    %11 = vector.broadcast %10 : vector<32x256xi1> to vector<32x256xi1>
    %12 = arith.xori %8, %11 : vector<32x256xi1>
    %13 = arith.andi %12, %6 : vector<32x256xi1>
    %14 = vector.broadcast %2 : i32 to vector<32x256xi32>
    %15 = arith.addi %4, %14 : vector<32x256xi32>
    %16 = arith.select %13, %15, %4 : vector<32x256xi1>, vector<32x256xi32>
    %c1_i32_3 = arith.constant 1 : i32
    %17 = vector.broadcast %c1_i32_3 : i32 to vector<32x256xi32>
    %18 = arith.cmpi sge, %16, %17 : vector<32x256xi32>
    %c8_i32 = arith.constant 8 : i32
    %19 = vector.broadcast %c8_i32 : i32 to vector<32x256xi32>
    %20 = arith.cmpi sle, %16, %19 : vector<32x256xi32>
    %21 = arith.andi %18, %20 : vector<32x256xi1>
    %cst = arith.constant 0.000000e+00 : f32
    %22 = vector.broadcast %cst : f32 to vector<1x256xf32>
    %c0 = arith.constant 0 : index
    %c0_4 = arith.constant 0 : index
    %23 = vector.load %arg1[%c0, %c0_4] : memref<32x256xbf16, #tpu.memory_space<vmem>>, vector<32x256xbf16>
    %c0_5 = arith.constant 0 : index
    %c0_6 = arith.constant 0 : index
    %c0_7 = arith.constant 0 : index
    %c0_8 = arith.constant 0 : index
    %24 = vector.load %arg2[%c0_5, %c0_6, %c0_7, %c0_8] : memref<2x3x256x256xbf16, #tpu.memory_space<vmem>>, vector<1x1x256x256xbf16>
    %25 = vector.shape_cast %24 : vector<1x1x256x256xbf16> to vector<256x256xbf16>
    %cst_9 = arith.constant dense<0.000000e+00> : vector<32x256xf32>
    %26 = tpu.matmul %23, %25, %cst_9 {dimension_numbers = #tpu.dot_dimension_numbers<[1], [0], [0], [1], [0, 0, 1, 1], [], []>} : vector<32x256xbf16>, vector<256x256xbf16>, vector<32x256xf32> -> vector<32x256xf32>
    %c0_10 = arith.constant 0 : index
    %c1 = arith.constant 1 : index
    %c0_11 = arith.constant 0 : index
    %c0_12 = arith.constant 0 : index
    %27 = vector.load %arg2[%c0_10, %c1, %c0_11, %c0_12] : memref<2x3x256x256xbf16, #tpu.memory_space<vmem>>, vector<1x1x256x256xbf16>
    %28 = vector.shape_cast %27 : vector<1x1x256x256xbf16> to vector<256x256xbf16>
    %cst_13 = arith.constant dense<0.000000e+00> : vector<32x256xf32>
    %29 = tpu.matmul %23, %28, %cst_13 {dimension_numbers = #tpu.dot_dimension_numbers<[1], [0], [0], [1], [0, 0, 1, 1], [], []>} : vector<32x256xbf16>, vector<256x256xbf16>, vector<32x256xf32> -> vector<32x256xf32>
    %c0_14 = arith.constant 0 : index
    %c2 = arith.constant 2 : index
    %c0_15 = arith.constant 0 : index
    %c0_16 = arith.constant 0 : index
    %30 = vector.load %arg2[%c0_14, %c2, %c0_15, %c0_16] : memref<2x3x256x256xbf16, #tpu.memory_space<vmem>>, vector<1x1x256x256xbf16>
    %31 = vector.shape_cast %30 : vector<1x1x256x256xbf16> to vector<256x256xbf16>
    %cst_17 = arith.constant dense<0.000000e+00> : vector<32x256xf32>
    %32 = tpu.matmul %23, %31, %cst_17 {dimension_numbers = #tpu.dot_dimension_numbers<[1], [0], [0], [1], [0, 0, 1, 1], [], []>} : vector<32x256xbf16>, vector<256x256xbf16>, vector<32x256xf32> -> vector<32x256xf32>
    %33 = vector.extract_strided_slice %26 {offsets = [0, 0], sizes = [31, 256], strides = [1, 1]} : vector<32x256xf32> to vector<31x256xf32>
    %34 = tpu.concatenate %22, %33 in 0 : vector<1x256xf32>, vector<31x256xf32> -> vector<32x256xf32>
    %35 = arith.addf %29, %34 : vector<32x256xf32>
    %36 = vector.extract_strided_slice %32 {offsets = [1, 0], sizes = [31, 256], strides = [1, 1]} : vector<32x256xf32> to vector<31x256xf32>
    %37 = tpu.concatenate %36, %22 in 0 : vector<31x256xf32>, vector<1x256xf32> -> vector<32x256xf32>
    %38 = arith.addf %35, %37 : vector<32x256xf32>
    %cst_18 = arith.constant 0.000000e+00 : f32
    %39 = vector.broadcast %cst_18 : f32 to vector<32x256xf32>
    %40 = arith.select %21, %38, %39 : vector<32x256xi1>, vector<32x256xf32>
    %c0_19 = arith.constant 0 : index
    %c0_20 = arith.constant 0 : index
    %41 = vector.load %arg3[%c0_19, %c0_20] : memref<4x256xf32, #tpu.memory_space<vmem>>, vector<1x256xf32>
    %c1_21 = arith.constant 1 : index
    %c0_22 = arith.constant 0 : index
    %42 = vector.load %arg3[%c1_21, %c0_22] : memref<4x256xf32, #tpu.memory_space<vmem>>, vector<1x256xf32>
    %cst_23 = arith.constant dense<0.000000e+00> : vector<256xf32>
    %43 = vector.multi_reduction <add>, %40, %cst_23 [0] : vector<32x256xf32> to vector<256xf32>
    %44 = vector.shape_cast %43 : vector<256xf32> to vector<1x256xf32>
    %c32_i32 = arith.constant 32 : i32
    %45 = tpu.dynamic_rotate %44 by %c32_i32 dim 1 : vector<1x256xf32>, i32 -> vector<1x256xf32>
    %46 = arith.addf %44, %45 : vector<1x256xf32>
    %c64_i32 = arith.constant 64 : i32
    %47 = tpu.dynamic_rotate %44 by %c64_i32 dim 1 : vector<1x256xf32>, i32 -> vector<1x256xf32>
    %48 = arith.addf %46, %47 : vector<1x256xf32>
    %c96_i32 = arith.constant 96 : i32
    %49 = tpu.dynamic_rotate %44 by %c96_i32 dim 1 : vector<1x256xf32>, i32 -> vector<1x256xf32>
    %50 = arith.addf %48, %49 : vector<1x256xf32>
    %c128_i32 = arith.constant 128 : i32
    %51 = tpu.dynamic_rotate %44 by %c128_i32 dim 1 : vector<1x256xf32>, i32 -> vector<1x256xf32>
    %52 = arith.addf %50, %51 : vector<1x256xf32>
    %c160_i32 = arith.constant 160 : i32
    %53 = tpu.dynamic_rotate %44 by %c160_i32 dim 1 : vector<1x256xf32>, i32 -> vector<1x256xf32>
    %54 = arith.addf %52, %53 : vector<1x256xf32>
    %c192_i32 = arith.constant 192 : i32
    %55 = tpu.dynamic_rotate %44 by %c192_i32 dim 1 : vector<1x256xf32>, i32 -> vector<1x256xf32>
    %56 = arith.addf %54, %55 : vector<1x256xf32>
    %c224_i32 = arith.constant 224 : i32
    %57 = tpu.dynamic_rotate %44 by %c224_i32 dim 1 : vector<1x256xf32>, i32 -> vector<1x256xf32>
    %58 = arith.addf %56, %57 : vector<1x256xf32>
    %59 = arith.mulf %40, %40 : vector<32x256xf32>
    %cst_24 = arith.constant dense<0.000000e+00> : vector<256xf32>
    %60 = vector.multi_reduction <add>, %59, %cst_24 [0] : vector<32x256xf32> to vector<256xf32>
    %61 = vector.shape_cast %60 : vector<256xf32> to vector<1x256xf32>
    %c32_i32_25 = arith.constant 32 : i32
    %62 = tpu.dynamic_rotate %61 by %c32_i32_25 dim 1 : vector<1x256xf32>, i32 -> vector<1x256xf32>
    %63 = arith.addf %61, %62 : vector<1x256xf32>
    %c64_i32_26 = arith.constant 64 : i32
    %64 = tpu.dynamic_rotate %61 by %c64_i32_26 dim 1 : vector<1x256xf32>, i32 -> vector<1x256xf32>
    %65 = arith.addf %63, %64 : vector<1x256xf32>
    %c96_i32_27 = arith.constant 96 : i32
    %66 = tpu.dynamic_rotate %61 by %c96_i32_27 dim 1 : vector<1x256xf32>, i32 -> vector<1x256xf32>
    %67 = arith.addf %65, %66 : vector<1x256xf32>
    %c128_i32_28 = arith.constant 128 : i32
    %68 = tpu.dynamic_rotate %61 by %c128_i32_28 dim 1 : vector<1x256xf32>, i32 -> vector<1x256xf32>
    %69 = arith.addf %67, %68 : vector<1x256xf32>
    %c160_i32_29 = arith.constant 160 : i32
    %70 = tpu.dynamic_rotate %61 by %c160_i32_29 dim 1 : vector<1x256xf32>, i32 -> vector<1x256xf32>
    %71 = arith.addf %69, %70 : vector<1x256xf32>
    %c192_i32_30 = arith.constant 192 : i32
    %72 = tpu.dynamic_rotate %61 by %c192_i32_30 dim 1 : vector<1x256xf32>, i32 -> vector<1x256xf32>
    %73 = arith.addf %71, %72 : vector<1x256xf32>
    %c224_i32_31 = arith.constant 224 : i32
    %74 = tpu.dynamic_rotate %61 by %c224_i32_31 dim 1 : vector<1x256xf32>, i32 -> vector<1x256xf32>
    %75 = arith.addf %73, %74 : vector<1x256xf32>
    %cst_32 = arith.constant 7.812500e-03 : f32
    %76 = vector.broadcast %cst_32 : f32 to vector<1x256xf32>
    %77 = arith.mulf %58, %76 : vector<1x256xf32>
    %cst_33 = arith.constant 7.812500e-03 : f32
    %78 = vector.broadcast %cst_33 : f32 to vector<1x256xf32>
    %79 = arith.mulf %75, %78 : vector<1x256xf32>
    %80 = arith.mulf %77, %77 : vector<1x256xf32>
    %81 = arith.subf %79, %80 : vector<1x256xf32>
    %cst_34 = arith.constant 9.99999974E-6 : f32
    %82 = vector.broadcast %cst_34 : f32 to vector<1x256xf32>
    %83 = arith.addf %81, %82 : vector<1x256xf32>
    %84 = math.rsqrt %83 : vector<1x256xf32>
    %85 = arith.mulf %41, %84 : vector<1x256xf32>
    %86 = arith.mulf %77, %85 : vector<1x256xf32>
    %87 = arith.subf %42, %86 : vector<1x256xf32>
    %88 = vector.broadcast %85 : vector<1x256xf32> to vector<32x256xf32>
    %89 = arith.mulf %40, %88 : vector<32x256xf32>
    %90 = vector.broadcast %87 : vector<1x256xf32> to vector<32x256xf32>
    %91 = arith.addf %89, %90 : vector<32x256xf32>
    %cst_35 = arith.constant 0.000000e+00 : f32
    %92 = vector.broadcast %cst_35 : f32 to vector<32x256xf32>
    %93 = arith.maximumf %91, %92 : vector<32x256xf32>
    %cst_36 = arith.constant 0.000000e+00 : f32
    %94 = vector.broadcast %cst_36 : f32 to vector<32x256xf32>
    %95 = arith.select %21, %93, %94 : vector<32x256xi1>, vector<32x256xf32>
    %96 = arith.truncf %95 : vector<32x256xf32> to vector<32x256xbf16>
    %c0_37 = arith.constant 0 : index
    %c0_38 = arith.constant 0 : index
    %97 = vector.load %arg5[%c0_37, %c0_38] : memref<32x256xbf16, #tpu.memory_space<vmem>>, vector<32x256xbf16>
    tpu.vector_store %arg5[%c0_37, %c0_38], %96 {strides = array<i32>} : memref<32x256xbf16, #tpu.memory_space<vmem>>, vector<32x256xbf16>,
    %c0_39 = arith.constant 0 : index
    %c0_40 = arith.constant 0 : index
    %98 = vector.load %arg5[%c0_39, %c0_40] : memref<32x256xbf16, #tpu.memory_space<vmem>>, vector<32x256xbf16>
    %c1_41 = arith.constant 1 : index
    %c0_42 = arith.constant 0 : index
    %c0_43 = arith.constant 0 : index
    %c0_44 = arith.constant 0 : index
    %99 = vector.load %arg2[%c1_41, %c0_42, %c0_43, %c0_44] : memref<2x3x256x256xbf16, #tpu.memory_space<vmem>>, vector<1x1x256x256xbf16>
    %100 = vector.shape_cast %99 : vector<1x1x256x256xbf16> to vector<256x256xbf16>
    %cst_45 = arith.constant dense<0.000000e+00> : vector<32x256xf32>
    %101 = tpu.matmul %98, %100, %cst_45 {dimension_numbers = #tpu.dot_dimension_numbers<[1], [0], [0], [1], [0, 0, 1, 1], [], []>} : vector<32x256xbf16>, vector<256x256xbf16>, vector<32x256xf32> -> vector<32x256xf32>
    %c1_46 = arith.constant 1 : index
    %c1_47 = arith.constant 1 : index
    %c0_48 = arith.constant 0 : index
    %c0_49 = arith.constant 0 : index
    %102 = vector.load %arg2[%c1_46, %c1_47, %c0_48, %c0_49] : memref<2x3x256x256xbf16, #tpu.memory_space<vmem>>, vector<1x1x256x256xbf16>
    %103 = vector.shape_cast %102 : vector<1x1x256x256xbf16> to vector<256x256xbf16>
    %cst_50 = arith.constant dense<0.000000e+00> : vector<32x256xf32>
    %104 = tpu.matmul %98, %103, %cst_50 {dimension_numbers = #tpu.dot_dimension_numbers<[1], [0], [0], [1], [0, 0, 1, 1], [], []>} : vector<32x256xbf16>, vector<256x256xbf16>, vector<32x256xf32> -> vector<32x256xf32>
    %c1_51 = arith.constant 1 : index
    %c2_52 = arith.constant 2 : index
    %c0_53 = arith.constant 0 : index
    %c0_54 = arith.constant 0 : index
    %105 = vector.load %arg2[%c1_51, %c2_52, %c0_53, %c0_54] : memref<2x3x256x256xbf16, #tpu.memory_space<vmem>>, vector<1x1x256x256xbf16>
    %106 = vector.shape_cast %105 : vector<1x1x256x256xbf16> to vector<256x256xbf16>
    %cst_55 = arith.constant dense<0.000000e+00> : vector<32x256xf32>
    %107 = tpu.matmul %98, %106, %cst_55 {dimension_numbers = #tpu.dot_dimension_numbers<[1], [0], [0], [1], [0, 0, 1, 1], [], []>} : vector<32x256xbf16>, vector<256x256xbf16>, vector<32x256xf32> -> vector<32x256xf32>
    %108 = vector.extract_strided_slice %101 {offsets = [0, 0], sizes = [31, 256], strides = [1, 1]} : vector<32x256xf32> to vector<31x256xf32>
    %109 = tpu.concatenate %22, %108 in 0 : vector<1x256xf32>, vector<31x256xf32> -> vector<32x256xf32>
    %110 = arith.addf %104, %109 : vector<32x256xf32>
    %111 = vector.extract_strided_slice %107 {offsets = [1, 0], sizes = [31, 256], strides = [1, 1]} : vector<32x256xf32> to vector<31x256xf32>
    %112 = tpu.concatenate %111, %22 in 0 : vector<31x256xf32>, vector<1x256xf32> -> vector<32x256xf32>
    %113 = arith.addf %110, %112 : vector<32x256xf32>
    %cst_56 = arith.constant 0.000000e+00 : f32
    %114 = vector.broadcast %cst_56 : f32 to vector<32x256xf32>
    %115 = arith.select %21, %113, %114 : vector<32x256xi1>, vector<32x256xf32>
    %c2_57 = arith.constant 2 : index
    %c0_58 = arith.constant 0 : index
    %116 = vector.load %arg3[%c2_57, %c0_58] : memref<4x256xf32, #tpu.memory_space<vmem>>, vector<1x256xf32>
    %c3 = arith.constant 3 : index
    %c0_59 = arith.constant 0 : index
    %117 = vector.load %arg3[%c3, %c0_59] : memref<4x256xf32, #tpu.memory_space<vmem>>, vector<1x256xf32>
    %cst_60 = arith.constant dense<0.000000e+00> : vector<256xf32>
    %118 = vector.multi_reduction <add>, %115, %cst_60 [0] : vector<32x256xf32> to vector<256xf32>
    %119 = vector.shape_cast %118 : vector<256xf32> to vector<1x256xf32>
    %c32_i32_61 = arith.constant 32 : i32
    %120 = tpu.dynamic_rotate %119 by %c32_i32_61 dim 1 : vector<1x256xf32>, i32 -> vector<1x256xf32>
    %121 = arith.addf %119, %120 : vector<1x256xf32>
    %c64_i32_62 = arith.constant 64 : i32
    %122 = tpu.dynamic_rotate %119 by %c64_i32_62 dim 1 : vector<1x256xf32>, i32 -> vector<1x256xf32>
    %123 = arith.addf %121, %122 : vector<1x256xf32>
    %c96_i32_63 = arith.constant 96 : i32
    %124 = tpu.dynamic_rotate %119 by %c96_i32_63 dim 1 : vector<1x256xf32>, i32 -> vector<1x256xf32>
    %125 = arith.addf %123, %124 : vector<1x256xf32>
    %c128_i32_64 = arith.constant 128 : i32
    %126 = tpu.dynamic_rotate %119 by %c128_i32_64 dim 1 : vector<1x256xf32>, i32 -> vector<1x256xf32>
    %127 = arith.addf %125, %126 : vector<1x256xf32>
    %c160_i32_65 = arith.constant 160 : i32
    %128 = tpu.dynamic_rotate %119 by %c160_i32_65 dim 1 : vector<1x256xf32>, i32 -> vector<1x256xf32>
    %129 = arith.addf %127, %128 : vector<1x256xf32>
    %c192_i32_66 = arith.constant 192 : i32
    %130 = tpu.dynamic_rotate %119 by %c192_i32_66 dim 1 : vector<1x256xf32>, i32 -> vector<1x256xf32>
    %131 = arith.addf %129, %130 : vector<1x256xf32>
    %c224_i32_67 = arith.constant 224 : i32
    %132 = tpu.dynamic_rotate %119 by %c224_i32_67 dim 1 : vector<1x256xf32>, i32 -> vector<1x256xf32>
    %133 = arith.addf %131, %132 : vector<1x256xf32>
    %134 = arith.mulf %115, %115 : vector<32x256xf32>
    %cst_68 = arith.constant dense<0.000000e+00> : vector<256xf32>
    %135 = vector.multi_reduction <add>, %134, %cst_68 [0] : vector<32x256xf32> to vector<256xf32>
    %136 = vector.shape_cast %135 : vector<256xf32> to vector<1x256xf32>
    %c32_i32_69 = arith.constant 32 : i32
    %137 = tpu.dynamic_rotate %136 by %c32_i32_69 dim 1 : vector<1x256xf32>, i32 -> vector<1x256xf32>
    %138 = arith.addf %136, %137 : vector<1x256xf32>
    %c64_i32_70 = arith.constant 64 : i32
    %139 = tpu.dynamic_rotate %136 by %c64_i32_70 dim 1 : vector<1x256xf32>, i32 -> vector<1x256xf32>
    %140 = arith.addf %138, %139 : vector<1x256xf32>
    %c96_i32_71 = arith.constant 96 : i32
    %141 = tpu.dynamic_rotate %136 by %c96_i32_71 dim 1 : vector<1x256xf32>, i32 -> vector<1x256xf32>
    %142 = arith.addf %140, %141 : vector<1x256xf32>
    %c128_i32_72 = arith.constant 128 : i32
    %143 = tpu.dynamic_rotate %136 by %c128_i32_72 dim 1 : vector<1x256xf32>, i32 -> vector<1x256xf32>
    %144 = arith.addf %142, %143 : vector<1x256xf32>
    %c160_i32_73 = arith.constant 160 : i32
    %145 = tpu.dynamic_rotate %136 by %c160_i32_73 dim 1 : vector<1x256xf32>, i32 -> vector<1x256xf32>
    %146 = arith.addf %144, %145 : vector<1x256xf32>
    %c192_i32_74 = arith.constant 192 : i32
    %147 = tpu.dynamic_rotate %136 by %c192_i32_74 dim 1 : vector<1x256xf32>, i32 -> vector<1x256xf32>
    %148 = arith.addf %146, %147 : vector<1x256xf32>
    %c224_i32_75 = arith.constant 224 : i32
    %149 = tpu.dynamic_rotate %136 by %c224_i32_75 dim 1 : vector<1x256xf32>, i32 -> vector<1x256xf32>
    %150 = arith.addf %148, %149 : vector<1x256xf32>
    %cst_76 = arith.constant 7.812500e-03 : f32
    %151 = vector.broadcast %cst_76 : f32 to vector<1x256xf32>
    %152 = arith.mulf %133, %151 : vector<1x256xf32>
    %cst_77 = arith.constant 7.812500e-03 : f32
    %153 = vector.broadcast %cst_77 : f32 to vector<1x256xf32>
    %154 = arith.mulf %150, %153 : vector<1x256xf32>
    %155 = arith.mulf %152, %152 : vector<1x256xf32>
    %156 = arith.subf %154, %155 : vector<1x256xf32>
    %cst_78 = arith.constant 9.99999974E-6 : f32
    %157 = vector.broadcast %cst_78 : f32 to vector<1x256xf32>
    %158 = arith.addf %156, %157 : vector<1x256xf32>
    %159 = math.rsqrt %158 : vector<1x256xf32>
    %160 = arith.mulf %116, %159 : vector<1x256xf32>
    %161 = arith.mulf %152, %160 : vector<1x256xf32>
    %162 = arith.subf %117, %161 : vector<1x256xf32>
    %163 = arith.extf %23 : vector<32x256xbf16> to vector<32x256xf32>
    %164 = vector.broadcast %160 : vector<1x256xf32> to vector<32x256xf32>
    %165 = arith.mulf %115, %164 : vector<32x256xf32>
    %166 = vector.broadcast %162 : vector<1x256xf32> to vector<32x256xf32>
    %167 = arith.addf %165, %166 : vector<32x256xf32>
    %168 = arith.addf %167, %163 : vector<32x256xf32>
    %cst_79 = arith.constant 0.000000e+00 : f32
    %169 = vector.broadcast %cst_79 : f32 to vector<32x256xf32>
    %170 = arith.maximumf %168, %169 : vector<32x256xf32>
    %cst_80 = arith.constant 0.000000e+00 : f32
    %171 = vector.broadcast %cst_80 : f32 to vector<32x256xf32>
    %172 = arith.select %21, %170, %171 : vector<32x256xi1>, vector<32x256xf32>
    %c0_81 = arith.constant 0 : index
    %c0_82 = arith.constant 0 : index
    %173 = vector.load %arg4[%c0_81, %c0_82] : memref<32x256xf32, #tpu.memory_space<vmem>>, vector<32x256xf32>
    tpu.vector_store %arg4[%c0_81, %c0_82], %172 {strides = array<i32>} : memref<32x256xf32, #tpu.memory_space<vmem>>, vector<32x256xf32>,
    return
  }
  func.func @transform_0(%arg0: i32) -> (i32, i32) {
    %c0_i32 = arith.constant 0 : i32
    %c0_i32_0 = arith.constant 0 : i32
    %c0_i32_1 = arith.constant 0 : i32
    return %c0_i32, %c0_i32_0 : i32, i32
  }
  func.func @transform_1(%arg0: i32) -> (i32, i32, i32, i32) {
    %c0_i32 = arith.constant 0 : i32
    %c0_i32_0 = arith.constant 0 : i32
    %c0_i32_1 = arith.constant 0 : i32
    %c0_i32_2 = arith.constant 0 : i32
    %c0_i32_3 = arith.constant 0 : i32
    return %c0_i32, %c0_i32_0, %c0_i32_1, %c0_i32_2 : i32, i32, i32, i32
  }
  func.func @transform_2(%arg0: i32) -> (i32, i32) {
    %c0_i32 = arith.constant 0 : i32
    %c0_i32_0 = arith.constant 0 : i32
    %c0_i32_1 = arith.constant 0 : i32
    return %c0_i32, %c0_i32_0 : i32, i32
  }
  func.func @transform_3(%arg0: i32) -> (i32, i32) {
    %c0_i32 = arith.constant 0 : i32
    %c0_i32_0 = arith.constant 0 : i32
    %c0_i32_1 = arith.constant 0 : i32
    return %c0_i32, %c0_i32_0 : i32, i32
  }
}

</mosaic_0001>

<bundles_post_ra>
// kernel: resblock_forward.1
= control target key start
LH: loop header
LB: loop body
LE: loop exit
PB: predicated region body
PF: predicated region fallthrough
CT: control target
= control target key end

     0   :  { %8 = vsyncpa [#allocation4], 0  ;;  %s2805_s12 = smov [#allocation3]   ;;  %s3318_s0 = inlined_call_operand.vmem [shape: bf16[32,256], index: 0, kind: input, shape index: {}]   ;;  %s3319_s1 = inlined_call_operand.hbm [shape: bf16[2,3,256,256], index: 1, kind: input, shape index: {}]   ;;  %s3320_s2 = inlined_call_operand.vmem [shape: f32[4,256], index: 2, kind: input, shape index: {}]   ;;  %s3321_s3 = inlined_call_operand.vmem [shape: f32[32,256], index: 3, kind: output, shape index: {}]  }
   0x1   :  { %s16_s13 = sshll.u32 %s2805_s12, 4  ;;  %s2781_s16 = scalar_lea.hbm %s3319_s1, 24576  ;;  %s17_s13 = int_to_ptr.vmem [resolvable:$true] %s16_s13 }
   0x2   :  { %p2782_p0 = scmp.ne.s32.totalorder %s3319_s1, %s2781_s16  ;;  %p2785_p1 = scmp.lt.u32.totalorder %s2781_s16, %s3319_s1 }
   0x4   :  { %p2787_p2 = pnand %p2785_p1, %p2782_p0 }
   0x6   :  { %2790 = shalt.err (!%p2787_p2)
}
   0x7   :  { %s2791_s21 = scalar_lea.vmem %s17_s13, 24576  ;;  %p2796_p4 = scmp.lt.s32.totalorder %s17_s13, %s17_s13 }
   0x8   :  { %p2792_p3 = scmp.ne.s32.totalorder %s17_s13, %s2791_s21  ;;  %p2797_p5 = scmp.lt.s32.totalorder %s2791_s21, %s2791_s21 }
   0xa   :  { %p2798_p6 = por %p2797_p5, %p2796_p4 }
   0xc   :  { %p2799_p7 = pnand %p2798_p6, %p2792_p3 }
   0xe   :  { %2802 = shalt.err (!%p2799_p7)
}
   0xf   :  { %s2806_s22 = smov 128   ;;  %s2807_s23 = smov 8  }
  0x10   :  { %22 = dma.hbm_to_vmem [thread:$0]  %s3319_s1, 24576, %s17_s13, [#allocation4], %s2806_s22, %s2806_s22, %s2807_s23  }
  0x11   :  { %2803 = dma.done.wait [#allocation4], 24576  }
  0x12   :  { %2804 = vsyncadd [#allocation4], 4294942720  ;;  %v2477_v0 = vld [vmem:[#allocation3 + $0x4] ss:$8 sps:$4 sm:$0xff]   ;;  %v2479_v1 = vld [vmem:[#allocation3] ss:$8 sps:$4 sm:$0xff]  }
  0x13   :  { %309 = vmatprep.subr.bf16.mxu0 %v2477_v0  ;;  %v2480_v2 = vld [vmem:[#allocation3 + $0x14] ss:$8 sps:$4 sm:$0xff]   ;;  %v2482_v3 = vld [vmem:[#allocation3 + $0x10] ss:$8 sps:$4 sm:$0xff]   ;;  %v2483_v4 = vld [vmem:[#allocation3 + $0x24] ss:$8 sps:$4 sm:$0xff]  }
  0x14   :  { %310 = vmatpush1.bf16.msra.mxu0 %v2479_v1  ;;  %v2485_v5 = vld [vmem:[#allocation3 + $0x20] ss:$8 sps:$4 sm:$0xff]   ;;  %v2486_v6 = vld [vmem:[#allocation3 + $0x34] ss:$8 sps:$4 sm:$0xff]   ;;  %v2488_v7 = vld [vmem:[#allocation3 + $0x30] ss:$8 sps:$4 sm:$0xff]  }
  0x15   :  { %311 = vmatprep.subr.bf16.mxu0 %v2480_v2  ;;  %v2489_v8 = vld [vmem:[#allocation3 + $0x44] ss:$8 sps:$4 sm:$0xff]   ;;  %v2491_v9 = vld [vmem:[#allocation3 + $0x40] ss:$8 sps:$4 sm:$0xff]   ;;  %v2492_v10 = vld [vmem:[#allocation3 + $0x54] ss:$8 sps:$4 sm:$0xff]  }
  0x16   :  { %v2494_v11 = vld [vmem:[#allocation3 + $0x50] ss:$8 sps:$4 sm:$0xff]   ;;  %v2518_v12 = vld [vmem:[#allocation3 + $0x204] ss:$8 sps:$4 sm:$0xff]   ;;  %v2521_v13 = vld [vmem:[#allocation3 + $0x200] ss:$8 sps:$4 sm:$0xff]  }
  0x17   :  { %v2495_v14 = vld [vmem:[#allocation3 + $0x64] ss:$8 sps:$4 sm:$0xff]   ;;  %588 = vmatprep.subr.bf16.mxu1 %v2518_v12  ;;  %v2524_v15 = vld [vmem:[#allocation3 + $0x214] ss:$8 sps:$4 sm:$0xff]   ;;  %v2527_v16 = vld [vmem:[#allocation3 + $0x210] ss:$8 sps:$4 sm:$0xff]  }
  0x18   :  { %312 = vmatpush1.bf16.msra.mxu0 %v2482_v3  ;;  %589 = vmatpush1.bf16.msra.mxu1 %v2521_v13  ;;  %v2497_v17 = vld [vmem:[#allocation3 + $0x60] ss:$8 sps:$4 sm:$0xff]   ;;  %v2498_v18 = vld [vmem:[#allocation3 + $0x74] ss:$8 sps:$4 sm:$0xff]   ;;  %v2530_v19 = vld [vmem:[#allocation3 + $0x224] ss:$8 sps:$4 sm:$0xff]  }
  0x19   :  { %313 = vmatprep.subr.bf16.mxu0 %v2483_v4  ;;  %590 = vmatprep.subr.bf16.mxu1 %v2524_v15  ;;  %v2500_v20 = vld [vmem:[#allocation3 + $0x70] ss:$8 sps:$4 sm:$0xff]   ;;  %v2847_v21 = vld [vmem:[%s3318_s0] sm:$0xff]  ;;  %v2852_v22 = vld [vmem:[%s3318_s0 + $0x8] sm:$0xff]  ;;  %vm649_vm0 = vcmask 1040384   ;;  %vm895_vm1 = vcmask 1046528  }
  0x1a   :  { %v2533_v23 = vld [vmem:[#allocation3 + $0x220] ss:$8 sps:$4 sm:$0xff]   ;;  %v2856_v24 = vcombine.high %v2847_v21, %v2852_v22  ;;  %v2536_v25 = vld [vmem:[#allocation3 + $0x234] ss:$8 sps:$4 sm:$0xff]   ;;  %v2501_v26 = vld [vmem:[#allocation3 + $0x84] ss:$8 sps:$4 sm:$0xff]   ;;  %v2868_v61 = vcombine.low %v2847_v21, %v2852_v22 }
  0x1b   :  { %v2541_v27 = vld [vmem:[#allocation3 + $0x230] ss:$8 sps:$4 sm:$0xff]   ;;  %v2503_v28 = vld [vmem:[#allocation3 + $0x80] ss:$8 sps:$4 sm:$0xff]   ;;  %v2542_v29 = vld [vmem:[#allocation3 + $0x244] ss:$8 sps:$4 sm:$0xff]  }
  0x1c   :  { %314 = vmatpush1.bf16.msra.mxu0 %v2485_v5  ;;  %591 = vmatpush1.bf16.msra.mxu1 %v2527_v16  ;;  %v2504_v30 = vld [vmem:[#allocation3 + $0x94] ss:$8 sps:$4 sm:$0xff]   ;;  %v2506_v31 = vld [vmem:[#allocation3 + $0x90] ss:$8 sps:$4 sm:$0xff]   ;;  %v2547_v32 = vld [vmem:[#allocation3 + $0x240] ss:$8 sps:$4 sm:$0xff]  }
  0x1d   :  { %315 = vmatprep.subr.bf16.mxu0 %v2486_v6  ;;  %592 = vmatprep.subr.bf16.mxu1 %v2530_v19  ;;  %v2550_v33 = vld [vmem:[#allocation3 + $0x254] ss:$8 sps:$4 sm:$0xff]   ;;  %v2507_v34 = vld [vmem:[#allocation3 + $0xa4] ss:$8 sps:$4 sm:$0xff]   ;;  %v2555_v35 = vld [vmem:[#allocation3 + $0x250] ss:$8 sps:$4 sm:$0xff]  }
  0x1e   :  { %341 = vmatprep.mubr.bf16.mxu0 %v2856_v24  ;;  %620 = vmatprep.mubr.bf16.mxu1 %v2856_v24  ;;  %v2509_v36 = vld [vmem:[#allocation3 + $0xa0] ss:$8 sps:$4 sm:$0xff]   ;;  %v2556_v37 = vld [vmem:[#allocation3 + $0x264] ss:$8 sps:$4 sm:$0xff]   ;;  %v2510_v38 = vld [vmem:[#allocation3 + $0xb4] ss:$8 sps:$4 sm:$0xff]  }
  0x1f   :  { %v2512_v39 = vld [vmem:[#allocation3 + $0xb0] ss:$8 sps:$4 sm:$0xff]   ;;  %v2561_v40 = vld [vmem:[#allocation3 + $0x260] ss:$8 sps:$4 sm:$0xff]   ;;  %v2562_v41 = vld [vmem:[#allocation3 + $0x274] ss:$8 sps:$4 sm:$0xff]  }
  0x20   :  { %316 = vmatpush1.bf16.msra.mxu0 %v2488_v7  ;;  %593 = vmatpush1.bf16.msra.mxu1 %v2533_v23  ;;  %v2513_v42 = vld [vmem:[#allocation3 + $0xc4] ss:$8 sps:$4 sm:$0xff]   ;;  %v2567_v43 = vld [vmem:[#allocation3 + $0x270] ss:$8 sps:$4 sm:$0xff]   ;;  %v2515_v44 = vld [vmem:[#allocation3 + $0xc0] ss:$8 sps:$4 sm:$0xff]  }
  0x21   :  { %317 = vmatprep.subr.bf16.mxu0 %v2489_v8  ;;  %594 = vmatprep.subr.bf16.mxu1 %v2536_v25  ;;  %v2568_v45 = vld [vmem:[#allocation3 + $0x284] ss:$8 sps:$4 sm:$0xff]   ;;  %v2516_v46 = vld [vmem:[#allocation3 + $0xd4] ss:$8 sps:$4 sm:$0xff]   ;;  %v2520_v47 = vld [vmem:[#allocation3 + $0xd0] ss:$8 sps:$4 sm:$0xff]  }
  0x22   :  { %v2573_v48 = vld [vmem:[#allocation3 + $0x280] ss:$8 sps:$4 sm:$0xff]   ;;  %v2574_v49 = vld [vmem:[#allocation3 + $0x294] ss:$8 sps:$4 sm:$0xff]   ;;  %v2522_v50 = vld [vmem:[#allocation3 + $0xe4] ss:$8 sps:$4 sm:$0xff]  }
  0x23   :  { %v2579_v51 = vld [vmem:[#allocation3 + $0x290] ss:$8 sps:$4 sm:$0xff]   ;;  %v2526_v52 = vld [vmem:[#allocation3 + $0xe0] ss:$8 sps:$4 sm:$0xff]   ;;  %v2580_v53 = vld [vmem:[#allocation3 + $0x2a4] ss:$8 sps:$4 sm:$0xff]  }
  0x24   :  { %318 = vmatpush1.bf16.msra.mxu0 %v2491_v9  ;;  %595 = vmatpush1.bf16.msra.mxu1 %v2541_v27  ;;  %v2528_v54 = vld [vmem:[#allocation3 + $0xf4] ss:$8 sps:$4 sm:$0xff]   ;;  %v2532_v55 = vld [vmem:[#allocation3 + $0xf0] ss:$8 sps:$4 sm:$0xff]   ;;  %v2540_v56 = vld [vmem:[#allocation3 + $0x104] ss:$8 sps:$4 sm:$0xff]  }
  0x25   :  { %319 = vmatprep.subr.bf16.mxu0 %v2492_v10  ;;  %596 = vmatprep.subr.bf16.mxu1 %v2542_v29  ;;  %v2585_v57 = vld [vmem:[#allocation3 + $0x2a0] ss:$8 sps:$4 sm:$0xff]   ;;  %v2586_v58 = vld [vmem:[#allocation3 + $0x2b4] ss:$8 sps:$4 sm:$0xff]   ;;  %v2591_v63 = vld [vmem:[#allocation3 + $0x2b0] ss:$8 sps:$4 sm:$0xff]  }
  0x26   :  { %v95_v59 = vld [vmem:[%s3318_s0 + $0x10] sm:$0xff]  ;;  %v96_v60 = vld [vmem:[%s3318_s0 + $0x18] sm:$0xff]  ;;  %v2538_v62 = vld [vmem:[#allocation3 + $0x100] ss:$8 sps:$4 sm:$0xff]   ;;  %s2808_s6 = smov 64   ;;  %s2809_s7 = smov 32  }
  0x27   :  { %v2546_v0 = vld [vmem:[#allocation3 + $0x114] ss:$8 sps:$4 sm:$0xff]   ;;  %v2870_v1 = vcombine.high %v95_v59, %v96_v60  ;;  %v2592_v2 = vld [vmem:[#allocation3 + $0x2c4] ss:$8 sps:$4 sm:$0xff]   ;;  %v2597_v3 = vld [vmem:[#allocation3 + $0x2c0] ss:$8 sps:$4 sm:$0xff]   ;;  %v2874_v10 = vcombine.low %v95_v59, %v96_v60 }
  0x28   :  { %320 = vmatpush1.bf16.msra.mxu0 %v2494_v11  ;;  %597 = vmatpush1.bf16.msra.mxu1 %v2547_v32  ;;  %v2544_v4 = vld [vmem:[#allocation3 + $0x110] ss:$8 sps:$4 sm:$0xff]   ;;  %v2598_v5 = vld [vmem:[#allocation3 + $0x2d4] ss:$8 sps:$4 sm:$0xff]   ;;  %v2554_v6 = vld [vmem:[#allocation3 + $0x124] ss:$8 sps:$4 sm:$0xff]  }
  0x29   :  { %321 = vmatprep.subr.bf16.mxu0 %v2495_v14  ;;  %598 = vmatprep.subr.bf16.mxu1 %v2550_v33  ;;  %v2603_v7 = vld [vmem:[#allocation3 + $0x2d0] ss:$8 sps:$4 sm:$0xff]   ;;  %v2552_v8 = vld [vmem:[#allocation3 + $0x120] ss:$8 sps:$4 sm:$0xff]   ;;  %v2604_v9 = vld [vmem:[#allocation3 + $0x2e4] ss:$8 sps:$4 sm:$0xff]  }
  0x2a   :  { %v2560_v11 = vld [vmem:[#allocation3 + $0x134] ss:$8 sps:$4 sm:$0xff]   ;;  %v2609_v12 = vld [vmem:[#allocation3 + $0x2e0] ss:$8 sps:$4 sm:$0xff]   ;;  %v2558_v13 = vld [vmem:[#allocation3 + $0x130] ss:$8 sps:$4 sm:$0xff]  }
  0x2b   :  { %v2610_v14 = vld [vmem:[#allocation3 + $0x2f4] ss:$8 sps:$4 sm:$0xff]   ;;  %v2566_v15 = vld [vmem:[#allocation3 + $0x144] ss:$8 sps:$4 sm:$0xff]   ;;  %v2615_v16 = vld [vmem:[#allocation3 + $0x2f0] ss:$8 sps:$4 sm:$0xff]  }
  0x2c   :  { %322 = vmatpush1.bf16.msra.mxu0 %v2497_v17  ;;  %599 = vmatpush1.bf16.msra.mxu1 %v2555_v35  ;;  %v2564_v17 = vld [vmem:[#allocation3 + $0x140] ss:$8 sps:$4 sm:$0xff]   ;;  %v2570_v19 = vld [vmem:[#allocation3 + $0x150] ss:$8 sps:$4 sm:$0xff]   ;;  %v2584_v22 = vld [vmem:[#allocation3 + $0x174] ss:$8 sps:$4 sm:$0xff]  }
  0x2d   :  { %323 = vmatprep.subr.bf16.mxu0 %v2498_v18  ;;  %600 = vmatprep.subr.bf16.mxu1 %v2556_v37  ;;  %v2572_v18 = vld [vmem:[#allocation3 + $0x154] ss:$8 sps:$4 sm:$0xff]   ;;  %v2576_v21 = vld [vmem:[#allocation3 + $0x160] ss:$8 sps:$4 sm:$0xff]   ;;  %v2582_v23 = vld [vmem:[#allocation3 + $0x170] ss:$8 sps:$4 sm:$0xff]  }
  0x2e   :  { %v2588_v25 = vld [vmem:[#allocation3 + $0x180] ss:$8 sps:$4 sm:$0xff]   ;;  %v2594_v27 = vld [vmem:[#allocation3 + $0x190] ss:$8 sps:$4 sm:$0xff]   ;;  %v2614_v32 = vld [vmem:[#allocation3 + $0x1c4] ss:$8 sps:$4 sm:$0xff]  }
  0x2f   :  { %v2600_v29 = vld [vmem:[#allocation3 + $0x1a0] ss:$8 sps:$4 sm:$0xff]   ;;  %v2616_v35 = vld [vmem:[#allocation3 + $0x1d0] ss:$8 sps:$4 sm:$0xff]   ;;  %s2810_s8 = smov 96  }
  0x30   :  { %324 = vmatpush1.bf16.msra.mxu0 %v2500_v20  ;;  %601 = vmatpush1.bf16.msra.mxu1 %v2561_v40  ;;  %v2578_v20 = vld [vmem:[#allocation3 + $0x164] ss:$8 sps:$4 sm:$0xff]   ;;  %v2612_v33 = vld [vmem:[#allocation3 + $0x1c0] ss:$8 sps:$4 sm:$0xff]  }
  0x31   :  { %325 = vmatprep.subr.bf16.mxu0 %v2501_v26  ;;  %602 = vmatprep.subr.bf16.mxu1 %v2562_v41  ;;  %v2596_v26 = vld [vmem:[#allocation3 + $0x194] ss:$8 sps:$4 sm:$0xff]   ;;  %v2619_v37 = vld [vmem:[#allocation3 + $0x1e0] ss:$8 sps:$4 sm:$0xff]  }
  0x34   :  { %326 = vmatpush1.bf16.msra.mxu0 %v2503_v28  ;;  %603 = vmatpush1.bf16.msra.mxu1 %v2567_v43  ;;  %v2602_v28 = vld [vmem:[#allocation3 + $0x1a4] ss:$8 sps:$4 sm:$0xff]  }
  0x35   :  { %327 = vmatprep.subr.bf16.mxu0 %v2504_v30  ;;  %604 = vmatprep.subr.bf16.mxu1 %v2568_v45  ;;  %v2608_v30 = vld [vmem:[#allocation3 + $0x1b4] ss:$8 sps:$4 sm:$0xff]  }
  0x38   :  { %328 = vmatpush1.bf16.msra.mxu0 %v2506_v31  ;;  %605 = vmatpush1.bf16.msra.mxu1 %v2573_v48  ;;  %v2606_v31 = vld [vmem:[#allocation3 + $0x1b0] ss:$8 sps:$4 sm:$0xff]  }
  0x39   :  { %329 = vmatprep.subr.bf16.mxu0 %v2507_v34  ;;  %606 = vmatprep.subr.bf16.mxu1 %v2574_v49  ;;  %v2618_v34 = vld [vmem:[#allocation3 + $0x1d4] ss:$8 sps:$4 sm:$0xff]  }
  0x3c   :  { %330 = vmatpush1.bf16.msra.mxu0 %v2509_v36  ;;  %607 = vmatpush1.bf16.msra.mxu1 %v2579_v51  ;;  %v2621_v36 = vld [vmem:[#allocation3 + $0x1e4] ss:$8 sps:$4 sm:$0xff]  }
  0x3d   :  { %331 = vmatprep.subr.bf16.mxu0 %v2510_v38  ;;  %608 = vmatprep.subr.bf16.mxu1 %v2580_v53  ;;  %v2624_v38 = vld [vmem:[#allocation3 + $0x1f4] ss:$8 sps:$4 sm:$0xff]  }
  0x40   :  { %332 = vmatpush1.bf16.msra.mxu0 %v2512_v39  ;;  %609 = vmatpush1.bf16.msra.mxu1 %v2585_v57  ;;  %v2622_v39 = vld [vmem:[#allocation3 + $0x1f0] ss:$8 sps:$4 sm:$0xff]  }
  0x41   :  { %333 = vmatprep.subr.bf16.mxu0 %v2513_v42  ;;  %610 = vmatprep.subr.bf16.mxu1 %v2586_v58 }
  0x44   :  { %334 = vmatpush1.bf16.msra.mxu0 %v2515_v44  ;;  %611 = vmatpush1.bf16.msra.mxu1 %v2591_v63 }
  0x45   :  { %335 = vmatprep.subr.bf16.mxu0 %v2516_v46  ;;  %612 = vmatprep.subr.bf16.mxu1 %v2592_v2 }
  0x48   :  { %336 = vmatpush1.bf16.msra.mxu0 %v2520_v47  ;;  %613 = vmatpush1.bf16.msra.mxu1 %v2597_v3 }
  0x49   :  { %337 = vmatprep.subr.bf16.mxu0 %v2522_v50  ;;  %614 = vmatprep.subr.bf16.mxu1 %v2598_v5 }
  0x4c   :  { %338 = vmatpush1.bf16.msra.mxu0 %v2526_v52  ;;  %615 = vmatpush1.bf16.msra.mxu1 %v2603_v7 }
  0x4d   :  { %339 = vmatprep.subr.bf16.mxu0 %v2528_v54  ;;  %616 = vmatprep.subr.bf16.mxu1 %v2604_v9 }
  0x50   :  { %340 = vmatpush1.bf16.msra.mxu0 %v2532_v55  ;;  %617 = vmatpush1.bf16.msra.mxu1 %v2609_v12 }
  0x51   :  { %834 = vmatprep.subr.bf16.mxu0 %v2540_v56  ;;  %618 = vmatprep.subr.bf16.mxu1 %v2610_v14 }
  0x53   :  { %342 = vmatmul.mubr.bf16.vlgmr.msra.gmra.mrb[0].mxu0 %v2868_v61 }
  0x54   :  { %835 = vmatpush1.bf16.msra.mxu0 %v2538_v62  ;;  %351 = vmatprep.mubr.bf16.mxu0 %v2870_v1 }
  0x55   :  { %836 = vmatprep.subr.bf16.mxu0 %v2546_v0  ;;  %619 = vmatpush1.bf16.msra.mxu1 %v2615_v16 }
  0x58   :  { %837 = vmatpush1.bf16.msra.mxu0 %v2544_v4  ;;  %621 = vmatmul.mubr.bf16.vlgmr.msra.gmra.mrb[0].mxu1 %v2868_v61 }
  0x59   :  { %838 = vmatprep.subr.bf16.mxu0 %v2554_v6  ;;  %630 = vmatprep.mubr.bf16.mxu1 %v2870_v1 }
  0x5b   :  { %352 = vmatmul.mubr.bf16.gmra.mrb[4].mxu0 %v2874_v10 }
  0x5c   :  { %839 = vmatpush1.bf16.msra.mxu0 %v2552_v8  ;;  %866 = vmatprep.mubr.bf16.mxu0 %v2856_v24  ;;  %v2590_v24 = vld [vmem:[#allocation3 + $0x184] ss:$8 sps:$4 sm:$0xff]  }
  0x5d   :  { %840 = vmatprep.subr.bf16.mxu0 %v2560_v11 }
  0x60   :  { %841 = vmatpush1.bf16.msra.mxu0 %v2558_v13  ;;  %631 = vmatmul.mubr.bf16.gmra.mrb[4].mxu1 %v2874_v10 }
  0x61   :  { %842 = vmatprep.subr.bf16.mxu0 %v2566_v15 }
  0x64   :  { %843 = vmatpush1.bf16.msra.mxu0 %v2564_v17 }
  0x65   :  { %844 = vmatprep.subr.bf16.mxu0 %v2572_v18 }
  0x68   :  { %845 = vmatpush1.bf16.msra.mxu0 %v2570_v19 }
  0x69   :  { %846 = vmatprep.subr.bf16.mxu0 %v2578_v20  ;;  %v28_v20 = vlaneseq }
  0x6c   :  { %847 = vmatpush1.bf16.msra.mxu0 %v2576_v21  ;;  %v2901_v21 = vshrl.u32 %v28_v20, 7 }
  0x6d   :  { %848 = vmatprep.subr.bf16.mxu0 %v2584_v22 }
  0x6e   :  { %v30_v22 = vadd.s32 8, %v2901_v21 }
  0x70   :  { %849 = vmatpush1.bf16.msra.mxu0 %v2582_v23 }
  0x71   :  { %850 = vmatprep.subr.bf16.mxu0 %v2590_v24 }
  0x74   :  { %851 = vmatpush1.bf16.msra.mxu0 %v2588_v25  ;;  %v44_v25 = vand.u32 15, %v30_v22 }
  0x75   :  { %852 = vmatprep.subr.bf16.mxu0 %v2596_v26  ;;  %v37_v26 = vand.u32 15, %v2901_v21 }
  0x76   :  { %vm2909_vm2 = vcmp.le.s32.totalorder %v44_v25, 8 }
  0x77   :  { %vm2913_vm3 = vcmp.ge.s32.totalorder %v37_v26, 1 }
  0x78   :  { %853 = vmatpush1.bf16.msra.mxu0 %v2594_v27  ;;  %vm3088_vm9 = vmpackc.low %vm2909_vm2, %vm2913_vm3 }
  0x79   :  { %854 = vmatprep.subr.bf16.mxu0 %v2602_v28 }
  0x7c   :  { %855 = vmatpush1.bf16.msra.mxu0 %v2600_v29 }
  0x7d   :  { %856 = vmatprep.subr.bf16.mxu0 %v2608_v30  ;;  %v31_v30 = vadd.s32 16, %v2901_v21 }
  0x80   :  { %857 = vmatpush1.bf16.msra.mxu0 %v2606_v31 }
  0x81   :  { %858 = vmatprep.subr.bf16.mxu0 %v2614_v32 }
  0x84   :  { %859 = vmatpush1.bf16.msra.mxu0 %v2612_v33  ;;  %v32_v33 = vadd.s32 24, %v2901_v21 }
  0x85   :  { %860 = vmatprep.subr.bf16.mxu0 %v2618_v34 }
  0x88   :  { %861 = vmatpush1.bf16.msra.mxu0 %v2616_v35 }
  0x89   :  { %862 = vmatprep.subr.bf16.mxu0 %v2621_v36 }
  0x8c   :  { %863 = vmatpush1.bf16.msra.mxu0 %v2619_v37 }
  0x8d   :  { %864 = vmatprep.subr.bf16.mxu0 %v2624_v38 }
  0x90   :  { %865 = vmatpush1.bf16.msra.mxu0 %v2622_v39 }
  0x93   :  { %867 = vmatmul.mubr.bf16.vlgmr.msra.gmra.mrb[8].mxu0 %v2868_v61 }
  0x94   :  { %876 = vmatprep.mubr.bf16.mxu0 %v2870_v1 }
  0x9b   :  { %877 = vmatmul.mubr.bf16.gmra.mrb[12].mxu0 %v2874_v10 }
 0x126   :  { %v343_v40 = vpop.f32.mrb[0].mxu0 }
 0x127   :  { %v650_v41 = vrot.slane %v343_v40, 7  ;;  %v345_v42 = vpop.f32.mrb[1].mxu0 }
 0x128   :  { %v347_v43 = vpop.f32.mrb[2].mxu0  ;;  %v651_v46 = vrot.slane %v345_v42, 7  ;;  %v51_v42 = vand.u32 15, %v31_v30 }
 0x129   :  { %v652_v44 = vrot.slane %v347_v43, 7  ;;  %v349_v45 = vpop.f32.mrb[3].mxu0  ;;  %v672_v23 = vsel %vm649_vm0, 0.0, %v650_v41 }
 0x12a   :  { %v654_v47 = vrot.slane %v349_v45, 7  ;;  %v673_v28 = vsel %vm649_vm0, 0.0, %v651_v46  ;;  %vm2935_vm4 = vcmp.ge.s32.totalorder %v51_v42, 1 }
 0x12b   :  { %v653_v48 = vsel %vm649_vm0, %v650_v41, %v652_v44  ;;  %v622_v62 = vpop.f32.mrb[0].mxu1 }
 0x12c   :  { %v655_v49 = vsel %vm649_vm0, %v651_v46, %v654_v47  ;;  %v896_v63 = vrot.slane %v622_v62, 1  ;;  %v624_v0 = vpop.f32.mrb[1].mxu1 }
 0x12d   :  { %v899_v1 = vrot.slane %v624_v0, 1  ;;  %v626_v2 = vpop.f32.mrb[2].mxu1 }
 0x12e   :  { %v353_v50 = vpop.f32.mrb[4].mxu0  ;;  %v897_v3 = vrot.slane %v626_v2, 1  ;;  %v628_v4 = vpop.f32.mrb[3].mxu1 }
 0x12f   :  { %v656_v51 = vrot.slane %v353_v50, 7  ;;  %v355_v52 = vpop.f32.mrb[5].mxu0  ;;  %v900_v5 = vrot.slane %v628_v4, 1 }
 0x130   :  { %v658_v53 = vrot.slane %v355_v52, 7  ;;  %v357_v54 = vpop.f32.mrb[6].mxu0  ;;  %v898_v6 = vsel %vm895_vm1, %v896_v63, %v897_v3 }
 0x131   :  { %v660_v55 = vrot.slane %v357_v54, 7  ;;  %v359_v56 = vpop.f32.mrb[7].mxu0  ;;  %v657_v57 = vsel %vm649_vm0, %v652_v44, %v656_v51  ;;  %v901_v7 = vsel %vm895_vm1, %v899_v1, %v900_v5  ;;  %v58_v44 = vand.u32 15, %v32_v33 }
 0x132   :  { %v662_v58 = vrot.slane %v359_v56, 7  ;;  %v659_v59 = vsel %vm649_vm0, %v654_v47, %v658_v53 }
 0x133   :  { %v2889_v60 = vsel %vm649_vm0, %v656_v51, %v660_v55  ;;  %v632_v8 = vpop.f32.mrb[4].mxu1  ;;  %vm2941_vm5 = vcmp.le.s32.totalorder %v58_v44, 8 }
 0x134   :  { %v2892_v61 = vsel %vm649_vm0, %v658_v53, %v662_v58  ;;  %v902_v9 = vrot.slane %v632_v8, 1  ;;  %v634_v10 = vpop.f32.mrb[5].mxu1  ;;  %vm3100_vm10 = vmpackc.low %vm2941_vm5, %vm2935_vm4 }
 0x135   :  { %v904_v11 = vrot.slane %v634_v10, 1  ;;  %v636_v12 = vpop.f32.mrb[6].mxu1 }
 0x136   :  { %v903_v13 = vsel %vm895_vm1, %v897_v3, %v902_v9  ;;  %v906_v14 = vrot.slane %v636_v12, 1  ;;  %v638_v15 = vpop.f32.mrb[7].mxu1 }
 0x137   :  { %v905_v16 = vsel %vm895_vm1, %v900_v5, %v904_v11  ;;  %v908_v17 = vrot.slane %v638_v15, 1 }
 0x138   :  { %v907_v18 = vsel %vm895_vm1, %v902_v9, %v906_v14  ;;  %v918_v54 = vsel %vm895_vm1, %v906_v14, 0.0 }
 0x139   :  { %v909_v19 = vsel %vm895_vm1, %v904_v11, %v908_v17  ;;  %v919_v55 = vsel %vm895_vm1, %v908_v17, 0.0 }
 0x166   :  { %v868_v24 = vpop.f32.mrb[8].mxu0 }
 0x167   :  { %v869_v27 = vadd.f32 %v868_v24, %v672_v23  ;;  %v870_v29 = vpop.f32.mrb[9].mxu0 }
 0x168   :  { %v871_v31 = vadd.f32 %v870_v29, %v673_v28  ;;  %v872_v32 = vpop.f32.mrb[10].mxu0 }
 0x169   :  { %v920_v34 = vadd.f32 %v898_v6, %v869_v27  ;;  %v873_v35 = vadd.f32 %v872_v32, %v653_v48  ;;  %v874_v36 = vpop.f32.mrb[11].mxu0 }
 0x16a   :  { %v921_v37 = vadd.f32 %v901_v7, %v871_v31  ;;  %v875_v39 = vadd.f32 %v874_v36, %v655_v49 }
 0x16b   :  { %v922_v41 = vadd.f32 %v903_v13, %v873_v35  ;;  %v2923_v46 = vsel %vm2913_vm3, %v920_v34, 0.0 }
 0x16c   :  { %v923_v43 = vadd.f32 %v905_v16, %v875_v39  ;;  %v2931_v49 = vsel %vm2913_vm3, %v921_v37, 0.0  ;;  %v994_v63 = vmul.f32 %v2923_v46, %v2923_v46 }
 0x16d   :  { %v2919_v45 = vsel %vm2909_vm2, %v922_v41, 0.0  ;;  %v995_v3 = vmul.f32 %v2931_v49, %v2931_v49 }
 0x16e   :  { %v2927_v47 = vsel %vm2909_vm2, %v923_v43, 0.0  ;;  %v878_v48 = vpop.f32.mrb[12].mxu0  ;;  %v996_v50 = vmul.f32 %v2919_v45, %v2919_v45  ;;  %v2627_v43 = vld [vmem:[#allocation3 + $0x304] ss:$8 sps:$4 sm:$0xff]  }
 0x16f   :  { %v879_v52 = vadd.f32 %v878_v48, %v657_v57  ;;  %v880_v53 = vpop.f32.mrb[13].mxu0  ;;  %v997_v0 = vmul.f32 %v2927_v47, %v2927_v47  ;;  %v948_v7 = vadd.f32 %v2927_v47, %v2931_v49  ;;  %1363 = vmatprep.subr.bf16.mxu1 %v2627_v43  ;;  %v2687_v43 = vld [vmem:[#allocation3 + $0x3a4] ss:$8 sps:$4 sm:$0xff]  }
 0x170   :  { %v881_v56 = vadd.f32 %v880_v53, %v659_v59  ;;  %v882_v62 = vpop.f32.mrb[14].mxu0  ;;  %v939_v59 = vadd.f32 %v2919_v45, %v2923_v46  ;;  %v1002_v6 = vadd.f32 %v996_v50, %v994_v63  ;;  %v2630_v53 = vld [vmem:[#allocation3 + $0x504] ss:$8 sps:$4 sm:$0xff]  }
 0x171   :  { %v924_v1 = vadd.f32 %v907_v18, %v879_v52  ;;  %v883_v57 = vadd.f32 %v882_v62, %v2889_v60  ;;  %v884_v2 = vpop.f32.mrb[15].mxu0  ;;  %v2625_v52 = vld [vmem:[#allocation3 + $0x300] ss:$8 sps:$4 sm:$0xff]   ;;  %1642 = vmatprep.subr.bf16.mxu0 %v2630_v53  ;;  %v2693_v53 = vld [vmem:[#allocation3 + $0x3b4] ss:$8 sps:$4 sm:$0xff]  }
 0x172   :  { %v925_v4 = vadd.f32 %v909_v19, %v881_v56  ;;  %v885_v5 = vadd.f32 %v884_v2, %v2892_v61  ;;  %v1011_v61 = vadd.f32 %v997_v0, %v995_v3  ;;  %1364 = vmatpush1.bf16.msra.mxu1 %v2625_v52  ;;  %v2631_v0 = vld [vmem:[#allocation3 + $0x310] ss:$8 sps:$4 sm:$0xff]   ;;  %v2688_v52 = vld [vmem:[#allocation3 + $0x5a0] ss:$8 sps:$4 sm:$0xff]  }
 0x173   :  { %v2959_v8 = vsel %vm2935_vm4, %v924_v1, 0.0  ;;  %v926_v9 = vadd.f32 %v918_v54, %v883_v57  ;;  %v2628_v54 = vld [vmem:[#allocation3 + $0x500] ss:$8 sps:$4 sm:$0xff]   ;;  %v2636_v1 = vld [vmem:[#allocation3 + $0x514] ss:$8 sps:$4 sm:$0xff]  }
 0x174   :  { %v940_v60 = vadd.f32 %v939_v59, %v2959_v8  ;;  %v998_v10 = vmul.f32 %v2959_v8, %v2959_v8  ;;  %v2966_v11 = vsel %vm2935_vm4, %v925_v4, 0.0  ;;  %v927_v12 = vadd.f32 %v919_v55, %v885_v5  ;;  %v2633_v55 = vld [vmem:[#allocation3 + $0x314] ss:$8 sps:$4 sm:$0xff]   ;;  %1643 = vmatpush1.bf16.msra.mxu0 %v2628_v54  ;;  %v2634_v57 = vld [vmem:[#allocation3 + $0x510] ss:$8 sps:$4 sm:$0xff]  }
 0x175   :  { %v949_v13 = vadd.f32 %v948_v7, %v2966_v11  ;;  %v999_v14 = vmul.f32 %v2966_v11, %v2966_v11  ;;  %v2973_v15 = vsel %vm2941_vm5, %v926_v9, 0.0  ;;  %1365 = vmatprep.subr.bf16.mxu1 %v2633_v55  ;;  %1644 = vmatprep.subr.bf16.mxu0 %v2636_v1  ;;  %v2639_v59 = vld [vmem:[#allocation3 + $0x324] ss:$8 sps:$4 sm:$0xff]   ;;  %v2637_v4 = vld [vmem:[#allocation3 + $0x320] ss:$8 sps:$4 sm:$0xff]  }
 0x176   :  { %v1003_v16 = vadd.f32 %v1002_v6, %v998_v10  ;;  %v941_v17 = vadd.f32 %v940_v60, %v2973_v15  ;;  %v1000_v18 = vmul.f32 %v2973_v15, %v2973_v15  ;;  %v2980_v19 = vsel %vm2941_vm5, %v927_v12, 0.0  ;;  %1366 = vmatpush1.bf16.msra.mxu1 %v2631_v0  ;;  %v2642_v5 = vld [vmem:[#allocation3 + $0x524] ss:$8 sps:$4 sm:$0xff]   ;;  %v2640_v6 = vld [vmem:[#allocation3 + $0x520] ss:$8 sps:$4 sm:$0xff]  }
 0x177   :  { %v1012_v22 = vadd.f32 %v1011_v61, %v999_v14  ;;  %v950_v23 = vadd.f32 %v949_v13, %v2980_v19  ;;  %v1001_v24 = vmul.f32 %v2980_v19, %v2980_v19  ;;  %1367 = vmatprep.subr.bf16.mxu1 %v2639_v59  ;;  %v2645_v60 = vld [vmem:[#allocation3 + $0x334] ss:$8 sps:$4 sm:$0xff]   ;;  %v2643_v10 = vld [vmem:[#allocation3 + $0x330] ss:$8 sps:$4 sm:$0xff]   ;;  %v2651_v13 = vld [vmem:[#allocation3 + $0x344] ss:$8 sps:$4 sm:$0xff]  }
 0x178   :  { %v942_v25 = vrot.slane %v941_v17, 4  ;;  %v1004_v26 = vadd.f32 %v1003_v16, %v1000_v18  ;;  %1645 = vmatpush1.bf16.msra.mxu0 %v2634_v57  ;;  %v2648_v12 = vld [vmem:[#allocation3 + $0x534] ss:$8 sps:$4 sm:$0xff]   ;;  %v2646_v61 = vld [vmem:[#allocation3 + $0x530] ss:$8 sps:$4 sm:$0xff]  }
 0x179   :  { %v951_v27 = vrot.slane %v950_v23, 4  ;;  %v1013_v28 = vadd.f32 %v1012_v22, %v1001_v24  ;;  %1646 = vmatprep.subr.bf16.mxu0 %v2642_v5  ;;  %v2649_v14 = vld [vmem:[#allocation3 + $0x340] ss:$8 sps:$4 sm:$0xff]   ;;  %v2654_v16 = vld [vmem:[#allocation3 + $0x544] ss:$8 sps:$4 sm:$0xff]  }
 0x17a   :  { %v943_v29 = vadd.f32 %v942_v25, %v941_v17  ;;  %v1005_v30 = vrot.slane %v1004_v26, 4  ;;  %1368 = vmatpush1.bf16.msra.mxu1 %v2637_v4  ;;  %v2652_v17 = vld [vmem:[#allocation3 + $0x540] ss:$8 sps:$4 sm:$0xff]   ;;  %v2657_v18 = vld [vmem:[#allocation3 + $0x354] ss:$8 sps:$4 sm:$0xff]  }
 0x17b   :  { %v952_v31 = vadd.f32 %v951_v27, %v950_v23  ;;  %v1014_v32 = vrot.slane %v1013_v28, 4  ;;  %1369 = vmatprep.subr.bf16.mxu1 %v2645_v60  ;;  %v2655_v22 = vld [vmem:[#allocation3 + $0x350] ss:$8 sps:$4 sm:$0xff]   ;;  %v2660_v23 = vld [vmem:[#allocation3 + $0x554] ss:$8 sps:$4 sm:$0xff]  }
 0x17c   :  { %v944_v33 = vrot.slane %v943_v29, 2  ;;  %v1006_v34 = vadd.f32 %v1005_v30, %v1004_v26  ;;  %1647 = vmatpush1.bf16.msra.mxu0 %v2640_v6  ;;  %v2658_v24 = vld [vmem:[#allocation3 + $0x550] ss:$8 sps:$4 sm:$0xff]   ;;  %v2663_v25 = vld [vmem:[#allocation3 + $0x364] ss:$8 sps:$4 sm:$0xff]  }
 0x17d   :  { %v953_v35 = vrot.slane %v952_v31, 2  ;;  %v1015_v37 = vadd.f32 %v1014_v32, %v1013_v28  ;;  %1648 = vmatprep.subr.bf16.mxu0 %v2648_v12  ;;  %v2661_v26 = vld [vmem:[#allocation3 + $0x360] ss:$8 sps:$4 sm:$0xff]   ;;  %v2666_v27 = vld [vmem:[#allocation3 + $0x564] ss:$8 sps:$4 sm:$0xff]  }
 0x17e   :  { %v945_v36 = vadd.f32 %v944_v33, %v943_v29  ;;  %v1007_v42 = vrot.slane %v1006_v34, 2  ;;  %1370 = vmatpush1.bf16.msra.mxu1 %v2643_v10  ;;  %v2664_v28 = vld [vmem:[#allocation3 + $0x560] ss:$8 sps:$4 sm:$0xff]   ;;  %v2669_v29 = vld [vmem:[#allocation3 + $0x374] ss:$8 sps:$4 sm:$0xff]  }
 0x17f   :  { %v954_v39 = vadd.f32 %v953_v35, %v952_v31  ;;  %v1016_v48 = vrot.slane %v1015_v37, 2  ;;  %1371 = vmatprep.subr.bf16.mxu1 %v2651_v13  ;;  %v2667_v30 = vld [vmem:[#allocation3 + $0x370] ss:$8 sps:$4 sm:$0xff]   ;;  %v2672_v31 = vld [vmem:[#allocation3 + $0x574] ss:$8 sps:$4 sm:$0xff]  }
 0x180   :  { %v946_v41 = vrot.slane %v945_v36, 1  ;;  %v1008_v56 = vadd.f32 %v1007_v42, %v1006_v34  ;;  %1649 = vmatpush1.bf16.msra.mxu0 %v2646_v61  ;;  %v2670_v32 = vld [vmem:[#allocation3 + $0x570] ss:$8 sps:$4 sm:$0xff]   ;;  %v2675_v33 = vld [vmem:[#allocation3 + $0x384] ss:$8 sps:$4 sm:$0xff]  }
 0x181   :  { %v955_v44 = vrot.slane %v954_v39, 1  ;;  %v1017_v62 = vadd.f32 %v1016_v48, %v1015_v37  ;;  %1650 = vmatprep.subr.bf16.mxu0 %v2654_v16  ;;  %v2673_v34 = vld [vmem:[#allocation3 + $0x380] ss:$8 sps:$4 sm:$0xff]   ;;  %v2678_v35 = vld [vmem:[#allocation3 + $0x584] ss:$8 sps:$4 sm:$0xff]  }
 0x182   :  { %v2985_v50 = vadd.f32 %v946_v41, %v945_v36  ;;  %v1009_v3 = vrot.slane %v1008_v56, 1  ;;  %1372 = vmatpush1.bf16.msra.mxu1 %v2649_v14  ;;  %v2676_v36 = vld [vmem:[#allocation3 + $0x580] ss:$8 sps:$4 sm:$0xff]   ;;  %v2681_v37 = vld [vmem:[#allocation3 + $0x394] ss:$8 sps:$4 sm:$0xff]  }
 0x183   :  { %v2991_v63 = vadd.f32 %v955_v44, %v954_v39  ;;  %v1018_v2 = vrot.slane %v1017_v62, 1  ;;  %1373 = vmatprep.subr.bf16.mxu1 %v2657_v18  ;;  %v2679_v39 = vld [vmem:[#allocation3 + $0x390] ss:$8 sps:$4 sm:$0xff]   ;;  %v2684_v41 = vld [vmem:[#allocation3 + $0x594] ss:$8 sps:$4 sm:$0xff]  }
 0x184   :  { %968 = vrot.lane.b32.xlu1 %v2985_v50, %s2808_s6  ;;  %957 = vrot.lane.b32.xlu0 %v2985_v50, %s2809_s7  ;;  %v3003_v9 = vadd.f32 %v1009_v3, %v1008_v56  ;;  %v2682_v42 = vld [vmem:[#allocation3 + $0x590] ss:$8 sps:$4 sm:$0xff]   ;;  %v2685_v44 = vld [vmem:[#allocation3 + $0x3a0] ss:$8 sps:$4 sm:$0xff]   ;;  %v2690_v48 = vld [vmem:[#allocation3 + $0x5a4] ss:$8 sps:$4 sm:$0xff]  }
 0x185   :  { %v3001_v7 = vadd.f32 %v1018_v2, %v1017_v62  ;;  %1651 = vmatpush1.bf16.msra.mxu0 %v2652_v17  ;;  %v2691_v54 = vld [vmem:[#allocation3 + $0x3b0] ss:$8 sps:$4 sm:$0xff]   ;;  %v2696_v55 = vld [vmem:[#allocation3 + $0x5b4] ss:$8 sps:$4 sm:$0xff]   ;;  %v2699_v62 = vld [vmem:[#allocation3 + $0x3c4] ss:$8 sps:$4 sm:$0xff]  }
 0x186   :  { %1652 = vmatprep.subr.bf16.mxu0 %v2660_v23  ;;  %1374 = vmatpush1.bf16.msra.mxu1 %v2655_v22  ;;  %v2694_v56 = vld [vmem:[#allocation3 + $0x5b0] ss:$8 sps:$4 sm:$0xff]   ;;  %v2702_v0 = vld [vmem:[#allocation3 + $0x5c4] ss:$8 sps:$4 sm:$0xff]   ;;  %v2697_v1 = vld [vmem:[#allocation3 + $0x3c0] ss:$8 sps:$4 sm:$0xff]  }
 0x187   :  { %1375 = vmatprep.subr.bf16.mxu1 %v2663_v25  ;;  %v2700_v57 = vld [vmem:[#allocation3 + $0x5c0] ss:$8 sps:$4 sm:$0xff]   ;;  %v2705_v2 = vld [vmem:[#allocation3 + $0x3d4] ss:$8 sps:$4 sm:$0xff]   ;;  %v2703_v59 = vld [vmem:[#allocation3 + $0x3d0] ss:$8 sps:$4 sm:$0xff]  }
 0x188   :  { %977 = vrot.lane.b32.xlu0 %v2985_v50, %s2810_s8  ;;  %970 = vrot.lane.b32.xlu1 %v2991_v63, %s2808_s6  ;;  %v2708_v3 = vld [vmem:[#allocation3 + $0x5d4] ss:$8 sps:$4 sm:$0xff]   ;;  %v2706_v4 = vld [vmem:[#allocation3 + $0x5d0] ss:$8 sps:$4 sm:$0xff]   ;;  %v2711_v5 = vld [vmem:[#allocation3 + $0x3e4] ss:$8 sps:$4 sm:$0xff]  }
 0x189   :  { %1653 = vmatpush1.bf16.msra.mxu0 %v2658_v24  ;;  %v2714_v6 = vld [vmem:[#allocation3 + $0x5e4] ss:$8 sps:$4 sm:$0xff]   ;;  %v2709_v60 = vld [vmem:[#allocation3 + $0x3e0] ss:$8 sps:$4 sm:$0xff]   ;;  %v2717_v12 = vld [vmem:[#allocation3 + $0x3f4] ss:$8 sps:$4 sm:$0xff]  }
 0x18a   :  { %1654 = vmatprep.subr.bf16.mxu0 %v2666_v27  ;;  %1376 = vmatpush1.bf16.msra.mxu1 %v2661_v26  ;;  %v2712_v10 = vld [vmem:[#allocation3 + $0x5e0] ss:$8 sps:$4 sm:$0xff]   ;;  %v2720_v61 = vld [vmem:[#allocation3 + $0x5f4] ss:$8 sps:$4 sm:$0xff]   ;;  %v2715_v13 = vld [vmem:[#allocation3 + $0x3f0] ss:$8 sps:$4 sm:$0xff]  }
 0x18b   :  { %1377 = vmatprep.subr.bf16.mxu1 %v2669_v29  ;;  %v2718_v14 = vld [vmem:[#allocation3 + $0x5f0] ss:$8 sps:$4 sm:$0xff]   ;;  %v2723_v16 = vld [vmem:[#allocation3 + $0x404] ss:$8 sps:$4 sm:$0xff]   ;;  %v3018_v23 = vand.u32 127, %v28_v20 }
 0x18c   :  { %979 = vrot.lane.b32.xlu1 %v2991_v63, %s2810_s8  ;;  %959 = vrot.lane.b32.xlu0 %v2991_v63, %s2809_s7 }
 0x18d   :  { %1655 = vmatpush1.bf16.msra.mxu0 %v2664_v28  ;;  %vm963_vm6 = vcmp.lt.s32.totalorder %v3018_v23, 32  ;;  %vm972_vm7 = vcmp.lt.s32.totalorder %v3018_v23, 64  ;;  %vm981_vm8 = vcmp.lt.s32.totalorder %v3018_v23, 96 }
 0x18e   :  { %1656 = vmatprep.subr.bf16.mxu0 %v2672_v31  ;;  %1378 = vmatpush1.bf16.msra.mxu1 %v2667_v30 }
 0x18f   :  { %1379 = vmatprep.subr.bf16.mxu1 %v2675_v33 }
 0x190   :  { %1022 = vrot.lane.b32.xlu1 %v3001_v7, %s2809_s7  ;;  %1020 = vrot.lane.b32.xlu0 %v3003_v9, %s2809_s7 }
 0x191   :  { %1657 = vmatpush1.bf16.msra.mxu0 %v2670_v32 }
 0x192   :  { %1658 = vmatprep.subr.bf16.mxu0 %v2678_v35  ;;  %1380 = vmatpush1.bf16.msra.mxu1 %v2673_v34 }
 0x193   :  { %1381 = vmatprep.subr.bf16.mxu1 %v2681_v37 }
 0x194   :  { %1030 = vrot.lane.b32.xlu1 %v3001_v7, %s2808_s6  ;;  %1028 = vrot.lane.b32.xlu0 %v3003_v9, %s2808_s6 }
 0x195   :  { %1659 = vmatpush1.bf16.msra.mxu0 %v2676_v36 }
 0x196   :  { %1660 = vmatprep.subr.bf16.mxu0 %v2684_v41  ;;  %1382 = vmatpush1.bf16.msra.mxu1 %v2679_v39 }
 0x197   :  { %1383 = vmatprep.subr.bf16.mxu1 %v2687_v43 }
 0x198   :  { %1038 = vrot.lane.b32.xlu1 %v3001_v7, %s2810_s8  ;;  %1036 = vrot.lane.b32.xlu0 %v3003_v9, %s2810_s8 }
 0x199   :  { %1661 = vmatpush1.bf16.msra.mxu0 %v2682_v42 }
 0x19a   :  { %1662 = vmatprep.subr.bf16.mxu0 %v2690_v48  ;;  %1384 = vmatpush1.bf16.msra.mxu1 %v2685_v44 }
 0x19b   :  { %1385 = vmatprep.subr.bf16.mxu1 %v2693_v53 }
 0x19d   :  { %1663 = vmatpush1.bf16.msra.mxu0 %v2688_v52 }
 0x19e   :  { %1664 = vmatprep.subr.bf16.mxu0 %v2696_v55  ;;  %1386 = vmatpush1.bf16.msra.mxu1 %v2691_v54 }
 0x19f   :  { %1387 = vmatprep.subr.bf16.mxu1 %v2699_v62 }
 0x1a1   :  { %1665 = vmatpush1.bf16.msra.mxu0 %v2694_v56 }
 0x1a2   :  { %1666 = vmatprep.subr.bf16.mxu0 %v2702_v0  ;;  %1388 = vmatpush1.bf16.msra.mxu1 %v2697_v1 }
 0x1a3   :  { %1389 = vmatprep.subr.bf16.mxu1 %v2705_v2 }
 0x1a5   :  { %1667 = vmatpush1.bf16.msra.mxu0 %v2700_v57 }
 0x1a6   :  { %1668 = vmatprep.subr.bf16.mxu0 %v2708_v3  ;;  %1390 = vmatpush1.bf16.msra.mxu1 %v2703_v59 }
 0x1a7   :  { %1391 = vmatprep.subr.bf16.mxu1 %v2711_v5 }
 0x1a9   :  { %1669 = vmatpush1.bf16.msra.mxu0 %v2706_v4 }
 0x1aa   :  { %1670 = vmatprep.subr.bf16.mxu0 %v2714_v6  ;;  %1392 = vmatpush1.bf16.msra.mxu1 %v2709_v60 }
 0x1ab   :  { %1393 = vmatprep.subr.bf16.mxu1 %v2717_v12 }
 0x1ad   :  { %1671 = vmatpush1.bf16.msra.mxu0 %v2712_v10 }
 0x1ae   :  { %1672 = vmatprep.subr.bf16.mxu0 %v2720_v61  ;;  %1394 = vmatpush1.bf16.msra.mxu1 %v2715_v13 }
 0x1af   :  { %1887 = vmatprep.subr.bf16.mxu1 %v2723_v16 }
 0x1b1   :  { %1673 = vmatpush1.bf16.msra.mxu0 %v2718_v14 }
 0x1f6   :  { %v969_v17 = vpop.permute.xlu1 %968  ;;  %v958_v18 = vpop.permute.xlu0 %957 }
 0x1fa   :  { %v978_v22 = vpop.permute.xlu0 %977  ;;  %v971_v24 = vpop.permute.xlu1 %970 }
 0x1fb   :  { %v973_v30 = vsel %vm972_vm7, %v969_v17, %v971_v24  ;;  %v974_v31 = vsel %vm972_vm7, %v971_v24, %v969_v17 }
 0x1fe   :  { %v980_v25 = vpop.permute.xlu1 %979  ;;  %v960_v26 = vpop.permute.xlu0 %959 }
 0x1ff   :  { %v964_v27 = vsel %vm963_vm6, %v958_v18, %v960_v26  ;;  %v965_v28 = vsel %vm963_vm6, %v960_v26, %v958_v18  ;;  %v982_v36 = vsel %vm981_vm8, %v978_v22, %v980_v25  ;;  %v983_v37 = vsel %vm981_vm8, %v980_v25, %v978_v22 }
 0x200   :  { %v966_v29 = vadd.f32 %v965_v28, %v2985_v50  ;;  %v967_v20 = vadd.f32 %v964_v27, %v2991_v63 }
 0x202   :  { %v975_v32 = vadd.f32 %v974_v31, %v966_v29  ;;  %v976_v33 = vadd.f32 %v973_v30, %v967_v20  ;;  %v1023_v34 = vpop.permute.xlu1 %1022  ;;  %v1021_v35 = vpop.permute.xlu0 %1020 }
 0x203   :  { %v1024_v42 = vsel %vm963_vm6, %v1021_v35, %v1023_v34  ;;  %v1025_v43 = vsel %vm963_vm6, %v1023_v34, %v1021_v35 }
 0x204   :  { %v984_v39 = vadd.f32 %v983_v37, %v975_v32  ;;  %v985_v41 = vadd.f32 %v982_v36, %v976_v33  ;;  %v1026_v0 = vadd.f32 %v1025_v43, %v3003_v9  ;;  %v1027_v1 = vadd.f32 %v1024_v42, %v3001_v7 }
 0x206   :  { %v986_v44 = vadd.f32 %v984_v39, %v2991_v63  ;;  %v987_v48 = vadd.f32 %v985_v41, %v2985_v50  ;;  %v1031_v52 = vpop.permute.xlu1 %1030  ;;  %v1029_v53 = vpop.permute.xlu0 %1028 }
 0x207   :  { %v1032_v54 = vsel %vm972_vm7, %v1029_v53, %v1031_v52  ;;  %v1033_v55 = vsel %vm972_vm7, %v1031_v52, %v1029_v53 }
 0x208   :  { %v988_v56 = vadd.f32 %v986_v44, %v964_v27  ;;  %v989_v62 = vadd.f32 %v987_v48, %v965_v28  ;;  %v1034_v3 = vadd.f32 %v1033_v55, %v1026_v0  ;;  %v1035_v63 = vadd.f32 %v1032_v54, %v1027_v1  ;;  %v2335_v1 = vld [vmem:[%s3320_s2 + $0x1] ss:$4 sm:$0x3] }
 0x209   :  { %v3067_v48 = vsub.s32 1, %v2901_v21 }
 0x20a   :  { %v990_v57 = vadd.f32 %v988_v56, %v973_v30  ;;  %v991_v2 = vadd.f32 %v989_v62, %v974_v31  ;;  %v1039_v59 = vpop.permute.xlu1 %1038  ;;  %v1037_v50 = vpop.permute.xlu0 %1036 }
 0x20b   :  { %v1040_v4 = vsel %vm981_vm8, %v1037_v50, %v1039_v59  ;;  %v1041_v5 = vsel %vm981_vm8, %v1039_v59, %v1037_v50 }
 0x20c   :  { %v1042_v6 = vadd.f32 %v1041_v5, %v1034_v3  ;;  %v1043_v60 = vadd.f32 %v1040_v4, %v1035_v63  ;;  %v992_v10 = vadd.f32 %v990_v57, %v982_v36  ;;  %v993_v12 = vadd.f32 %v991_v2, %v983_v37 }
 0x20e   :  { %v1044_v61 = vadd.f32 %v1042_v6, %v3001_v7  ;;  %v1045_v13 = vadd.f32 %v1043_v60, %v3003_v9  ;;  %v1052_v17 = vmul.f32 0.0078125, %v992_v10  ;;  %v1053_v18 = vmul.f32 0.0078125, %v993_v12 }
 0x20f   :  { %v2811_v7 = vmov 1966171168  }
 0x210   :  { %v1046_v14 = vadd.f32 %v1044_v61, %v1024_v42  ;;  %v1047_v16 = vadd.f32 %v1045_v13, %v1025_v43  ;;  %v1056_v27 = vmul.f32 %v1052_v17, %v1052_v17  ;;  %v1057_v28 = vmul.f32 %v1053_v18, %v1053_v18  ;;  %v936_v42 = vld [vmem:[%s3320_s2] ss:$4 sm:$0x3] }
 0x211   :  { %v1068_v9 = vunpack.c.l.s4 %v2811_v7  ;;  %v3063_v43 = vsub.s32 0, %v2901_v21  ;;  %v2732_v7 = vld [vmem:[#allocation3 + $0x434] ss:$8 sps:$4 sm:$0xff]  }
 0x212   :  { %v1048_v22 = vadd.f32 %v1046_v14, %v1032_v54  ;;  %v1049_v24 = vadd.f32 %v1047_v16, %v1033_v55 }
 0x213   :  { %v1069_v34 = vunpack.c.0.s8 %v1068_v9  ;;  %v2730_v9 = vld [vmem:[#allocation3 + $0x430] ss:$8 sps:$4 sm:$0xff]  }
 0x214   :  { %v1050_v25 = vadd.f32 %v1048_v22, %v1040_v4  ;;  %v1051_v26 = vadd.f32 %v1049_v24, %v1041_v5  ;;  %v2721_v24 = vld [vmem:[#allocation3 + $0x400] ss:$8 sps:$4 sm:$0xff]  }
 0x215   :  { %v3056_v36 = vsub.s32 %v1069_v34, %v2901_v21  ;;  %v2735_v34 = vld [vmem:[#allocation3 + $0x444] ss:$8 sps:$4 sm:$0xff]  }
 0x216   :  { %v1054_v29 = vmul.f32 0.0078125, %v1050_v25  ;;  %v1055_v20 = vmul.f32 0.0078125, %v1051_v26 }
 0x218   :  { %v1058_v30 = vsub.f32 %v1054_v29, %v1056_v27  ;;  %v1059_v31 = vsub.f32 %v1055_v20, %v1057_v28  ;;  %v2726_v27 = vld [vmem:[#allocation3 + $0x414] ss:$8 sps:$4 sm:$0xff]   ;;  %v2729_v20 = vld [vmem:[#allocation3 + $0x424] ss:$8 sps:$4 sm:$0xff]  }
 0x21a   :  { %v1060_v32 = vadd.f32 1e-05, %v1058_v30  ;;  %v1061_v33 = vadd.f32 1e-05, %v1059_v31 }
 0x21c   :  { %2769 = vrsqrt.f32 %v1060_v32  ;;  %v2727_v32 = vld [vmem:[#allocation3 + $0x420] ss:$8 sps:$4 sm:$0xff]  }
 0x21d   :  { %2771 = vrsqrt.f32 %v1061_v33 }
 0x226   :  { %v2770_v35 = vpop.eup %2769 }
 0x227   :  { %v2772_v37 = vpop.eup %2771 }
 0x228   :  { %v1066_v39 = vcombine.low %v2770_v35, %v2772_v37  ;;  %v2733_v35 = vld [vmem:[#allocation3 + $0x440] ss:$8 sps:$4 sm:$0xff]   ;;  %v2738_v37 = vld [vmem:[#allocation3 + $0x454] ss:$8 sps:$4 sm:$0xff]  }
 0x22a   :  { %v1073_v41 = vrot.slane %v1066_v39, %v3056_v36  ;;  %v2736_v39 = vld [vmem:[#allocation3 + $0x450] ss:$8 sps:$4 sm:$0xff]  }
 0x22c   :  { %v1080_v44 = vrot.slane %v1073_v41, %v3056_v36  ;;  %v2741_v41 = vld [vmem:[#allocation3 + $0x464] ss:$8 sps:$4 sm:$0xff]  }
 0x22e   :  { %v1082_v52 = vmul.f32 %v1080_v44, %v936_v42  ;;  %v2739_v42 = vld [vmem:[#allocation3 + $0x460] ss:$8 sps:$4 sm:$0xff]   ;;  %v2744_v44 = vld [vmem:[#allocation3 + $0x474] ss:$8 sps:$4 sm:$0xff]  }
 0x230   :  { %v1087_v53 = vrot.slane %v1082_v52, %v3063_v43  ;;  %v1091_v54 = vrot.slane %v1082_v52, %v3067_v48  ;;  %v2742_v52 = vld [vmem:[#allocation3 + $0x470] ss:$8 sps:$4 sm:$0xff]  }
 0x232   :  { %v1094_v55 = vmul.f32 %v1087_v53, %v1052_v17  ;;  %v1095_v56 = vmul.f32 %v1091_v54, %v1053_v18  ;;  %v1116_v21 = vmul.f32 %v1091_v54, %v2931_v49  ;;  %v1118_v3 = vmul.f32 %v1091_v54, %v2927_v47 }
 0x233   :  { %v1115_v50 = vmul.f32 %v1087_v53, %v2923_v46  ;;  %v1117_v4 = vmul.f32 %v1087_v53, %v2919_v45  ;;  %v1120_v5 = vmul.f32 %v1091_v54, %v2966_v11  ;;  %v1122_v6 = vmul.f32 %v1091_v54, %v2980_v19  ;;  %v2745_v54 = vld [vmem:[#allocation3 + $0x480] ss:$8 sps:$4 sm:$0xff]  }
 0x234   :  { %v1098_v62 = vcombine.low %v1094_v55, %v1095_v56  ;;  %v1119_v19 = vmul.f32 %v1087_v53, %v2959_v8  ;;  %v1121_v18 = vmul.f32 %v1087_v53, %v2973_v15  ;;  %v2724_v15 = vld [vmem:[#allocation3 + $0x410] ss:$8 sps:$4 sm:$0xff]   ;;  %v2747_v53 = vld [vmem:[#allocation3 + $0x484] ss:$8 sps:$4 sm:$0xff]   ;;  %v2750_v55 = vld [vmem:[#allocation3 + $0x494] ss:$8 sps:$4 sm:$0xff]  }
 0x235   :  { %v2748_v56 = vld [vmem:[#allocation3 + $0x490] ss:$8 sps:$4 sm:$0xff]  }
 0x236   :  { %v1105_v0 = vrot.slane %v1098_v62, %v3056_v36  ;;  %v2753_v62 = vld [vmem:[#allocation3 + $0x4a4] ss:$8 sps:$4 sm:$0xff]  }
 0x238   :  { %v1112_v57 = vrot.slane %v1105_v0, %v3056_v36  ;;  %v2751_v0 = vld [vmem:[#allocation3 + $0x4a0] ss:$8 sps:$4 sm:$0xff]  }
 0x23a   :  { %v1114_v2 = vsub.f32 %v2335_v1, %v1112_v57  ;;  %v2756_v1 = vld [vmem:[#allocation3 + $0x4b4] ss:$8 sps:$4 sm:$0xff]   ;;  %v2754_v57 = vld [vmem:[#allocation3 + $0x4b0] ss:$8 sps:$4 sm:$0xff]  }
 0x23c   :  { %v1127_v63 = vrot.slane %v1114_v2, %v3063_v43  ;;  %v1131_v59 = vrot.slane %v1114_v2, %v3067_v48  ;;  %v2759_v2 = vld [vmem:[#allocation3 + $0x4c4] ss:$8 sps:$4 sm:$0xff]  }
 0x23e   :  { %v1135_v60 = vadd.f32 %v1131_v59, %v1116_v21  ;;  %v1137_v10 = vadd.f32 %v1131_v59, %v1118_v3  ;;  %v1134_v12 = vadd.f32 %v1127_v63, %v1115_v50  ;;  %v1136_v61 = vadd.f32 %v1127_v63, %v1117_v4  ;;  %v2757_v21 = vld [vmem:[#allocation3 + $0x4c0] ss:$8 sps:$4 sm:$0xff]   ;;  %v2762_v3 = vld [vmem:[#allocation3 + $0x4d4] ss:$8 sps:$4 sm:$0xff]  }
 0x23f   :  { %v1139_v13 = vadd.f32 %v1131_v59, %v1120_v5  ;;  %v1141_v49 = vadd.f32 %v1131_v59, %v1122_v6  ;;  %v1138_v28 = vadd.f32 %v1127_v63, %v1119_v19  ;;  %v1140_v29 = vadd.f32 %v1127_v63, %v1121_v18  ;;  %v2760_v63 = vld [vmem:[#allocation3 + $0x4d0] ss:$8 sps:$4 sm:$0xff]   ;;  %v2765_v59 = vld [vmem:[#allocation3 + $0x4e4] ss:$8 sps:$4 sm:$0xff]   ;;  %v2763_v50 = vld [vmem:[#allocation3 + $0x4e0] ss:$8 sps:$4 sm:$0xff]  }
 0x240   :  { %v1143_v14 = vmax.f32 %v1135_v60, 0.0  ;;  %v1145_v47 = vmax.f32 %v1137_v10, 0.0  ;;  %v1142_v16 = vmax.f32 %v1134_v12, 0.0  ;;  %v1144_v17 = vmax.f32 %v1136_v61, 0.0  ;;  %v2768_v4 = vld [vmem:[#allocation3 + $0x4f4] ss:$8 sps:$4 sm:$0xff]  }
 0x241   :  { %v1147_v46 = vmax.f32 %v1139_v13, 0.0  ;;  %v1149_v11 = vmax.f32 %v1141_v49, 0.0  ;;  %v1146_v30 = vmax.f32 %v1138_v28, 0.0  ;;  %v1148_v31 = vmax.f32 %v1140_v29, 0.0  ;;  %v2766_v5 = vld [vmem:[#allocation3 + $0x4f0] ss:$8 sps:$4 sm:$0xff]  }
 0x242   :  { %v2435_v22 = vpack.c.bf16 %v1145_v47, %v1143_v14  ;;  %v3094_v25 = vpack.c.bf16 %v1144_v17, %v1142_v16 }
 0x243   :  { %v3108_v8 = vpack.c.bf16 %v1149_v11, %v1147_v46  ;;  %v2444_v33 = vpack.c.bf16 %v1148_v31, %v1146_v30 }
 0x244   :  { %2436 = vmatprep.mubr.msk.bf16.mxu1 %vm3088_vm9, %v2435_v22  ;;  %2448 = vmatprep.mubr.msk.bf16.mxu0 %vm3088_vm9, %v2435_v22 }
 0x245   :  { %2439 = vmatmul.mubr.msk.bf16.vlgmr.msra.gmra.mrb[8].mxu1 %vm3088_vm9, %v3094_v25  ;;  %2451 = vmatmul.mubr.msk.bf16.vlgmr.msra.gmra.mrb[16].mxu0 %vm3088_vm9, %v3094_v25 }
 0x246   :  { %1888 = vmatpush1.bf16.msra.mxu1 %v2721_v24  ;;  %2442 = vmatprep.mubr.msk.bf16.mxu1 %vm3100_vm10, %v3108_v8 }
 0x247   :  { %2454 = vmatprep.mubr.msk.bf16.mxu0 %vm3100_vm10, %v3108_v8  ;;  %1889 = vmatprep.subr.bf16.mxu1 %v2726_v27 }
 0x24a   :  { %1890 = vmatpush1.bf16.msra.mxu1 %v2724_v15 }
 0x24b   :  { %1891 = vmatprep.subr.bf16.mxu1 %v2729_v20 }
 0x24d   :  { %2445 = vmatmul.mubr.msk.bf16.gmra.mrb[12].mxu1 %vm3100_vm10, %v2444_v33  ;;  %2457 = vmatmul.mubr.msk.bf16.gmra.mrb[20].mxu0 %vm3100_vm10, %v2444_v33 }
 0x24e   :  { %1892 = vmatpush1.bf16.msra.mxu1 %v2727_v32  ;;  %2460 = vmatprep.mubr.msk.bf16.mxu1 %vm3088_vm9, %v2435_v22 }
 0x24f   :  { %1893 = vmatprep.subr.bf16.mxu1 %v2732_v7 }
 0x252   :  { %1894 = vmatpush1.bf16.msra.mxu1 %v2730_v9 }
 0x253   :  { %1895 = vmatprep.subr.bf16.mxu1 %v2735_v34 }
 0x256   :  { %1896 = vmatpush1.bf16.msra.mxu1 %v2733_v35 }
 0x257   :  { %1897 = vmatprep.subr.bf16.mxu1 %v2738_v37 }
 0x25a   :  { %1898 = vmatpush1.bf16.msra.mxu1 %v2736_v39 }
 0x25b   :  { %1899 = vmatprep.subr.bf16.mxu1 %v2741_v41 }
 0x25e   :  { %1900 = vmatpush1.bf16.msra.mxu1 %v2739_v42 }
 0x25f   :  { %1901 = vmatprep.subr.bf16.mxu1 %v2744_v44 }
 0x262   :  { %1902 = vmatpush1.bf16.msra.mxu1 %v2742_v52 }
 0x263   :  { %1903 = vmatprep.subr.bf16.mxu1 %v2747_v53 }
 0x266   :  { %1904 = vmatpush1.bf16.msra.mxu1 %v2745_v54 }
 0x267   :  { %1905 = vmatprep.subr.bf16.mxu1 %v2750_v55 }
 0x26a   :  { %1906 = vmatpush1.bf16.msra.mxu1 %v2748_v56 }
 0x26b   :  { %1907 = vmatprep.subr.bf16.mxu1 %v2753_v62 }
 0x26e   :  { %1908 = vmatpush1.bf16.msra.mxu1 %v2751_v0 }
 0x26f   :  { %1909 = vmatprep.subr.bf16.mxu1 %v2756_v1 }
 0x272   :  { %1910 = vmatpush1.bf16.msra.mxu1 %v2754_v57 }
 0x273   :  { %1911 = vmatprep.subr.bf16.mxu1 %v2759_v2 }
 0x276   :  { %1912 = vmatpush1.bf16.msra.mxu1 %v2757_v21 }
 0x277   :  { %1913 = vmatprep.subr.bf16.mxu1 %v2762_v3 }
 0x27a   :  { %1914 = vmatpush1.bf16.msra.mxu1 %v2760_v63 }
 0x27b   :  { %1915 = vmatprep.subr.bf16.mxu1 %v2765_v59 }
 0x27e   :  { %1916 = vmatpush1.bf16.msra.mxu1 %v2763_v50 }
 0x27f   :  { %1917 = vmatprep.subr.bf16.mxu1 %v2768_v4 }
 0x282   :  { %1918 = vmatpush1.bf16.msra.mxu1 %v2766_v5 }
 0x285   :  { %2463 = vmatmul.mubr.msk.bf16.vlgmr.msra.gmra.mrb[16].mxu1 %vm3088_vm9, %v3094_v25 }
 0x286   :  { %2466 = vmatprep.mubr.msk.bf16.mxu1 %vm3100_vm10, %v3108_v8 }
 0x28d   :  { %2469 = vmatmul.mubr.msk.bf16.gmra.mrb[20].mxu1 %vm3100_vm10, %v2444_v33 }
 0x318   :  { %v1397_v6 = vpop.f32.mrb[8].mxu1  ;;  %v1676_v60 = vpop.f32.mrb[16].mxu0 }
 0x319   :  { %v1399_v10 = vpop.f32.mrb[9].mxu1  ;;  %v1678_v12 = vpop.f32.mrb[17].mxu0  ;;  %v1703_v49 = vrot.slane %v1397_v6, 7  ;;  %v1948_v14 = vrot.slane %v1676_v60, 1 }
 0x31a   :  { %v1401_v61 = vpop.f32.mrb[10].mxu1  ;;  %v1680_v13 = vpop.f32.mrb[18].mxu0  ;;  %v1704_v46 = vrot.slane %v1399_v10, 7  ;;  %v1951_v11 = vrot.slane %v1678_v12, 1 }
 0x31b   :  { %v1705_v47 = vrot.slane %v1401_v61, 7  ;;  %v1949_v16 = vrot.slane %v1680_v13, 1  ;;  %v1403_v17 = vpop.f32.mrb[11].mxu1  ;;  %v1682_v45 = vpop.f32.mrb[19].mxu0  ;;  %v1725_v62 = vsel %vm649_vm0, 0.0, %v1703_v49 }
 0x31c   :  { %v1707_v19 = vrot.slane %v1403_v17, 7  ;;  %v1952_v18 = vrot.slane %v1682_v45, 1  ;;  %v1726_v57 = vsel %vm649_vm0, 0.0, %v1704_v46 }
 0x31d   :  { %v1950_v22 = vsel %vm895_vm1, %v1948_v14, %v1949_v16  ;;  %v1706_v24 = vsel %vm649_vm0, %v1703_v49, %v1705_v47 }
 0x31e   :  { %v1953_v25 = vsel %vm895_vm1, %v1951_v11, %v1952_v18  ;;  %v1708_v26 = vsel %vm649_vm0, %v1704_v46, %v1707_v19 }
 0x320   :  { %v1407_v27 = vpop.f32.mrb[12].mxu1  ;;  %v1686_v28 = vpop.f32.mrb[20].mxu0 }
 0x321   :  { %v1709_v29 = vrot.slane %v1407_v27, 7  ;;  %v1954_v8 = vrot.slane %v1686_v28, 1  ;;  %v1409_v15 = vpop.f32.mrb[13].mxu1  ;;  %v1688_v20 = vpop.f32.mrb[21].mxu0 }
 0x322   :  { %v1711_v30 = vrot.slane %v1409_v15, 7  ;;  %v1956_v31 = vrot.slane %v1688_v20, 1  ;;  %v1411_v32 = vpop.f32.mrb[14].mxu1  ;;  %v1690_v33 = vpop.f32.mrb[22].mxu0 }
 0x323   :  { %v1713_v7 = vrot.slane %v1411_v32, 7  ;;  %v1958_v9 = vrot.slane %v1690_v33, 1  ;;  %v1413_v34 = vpop.f32.mrb[15].mxu1  ;;  %v1692_v35 = vpop.f32.mrb[23].mxu0  ;;  %v1955_v37 = vsel %vm895_vm1, %v1949_v16, %v1954_v8  ;;  %v1710_v39 = vsel %vm649_vm0, %v1705_v47, %v1709_v29 }
 0x324   :  { %v1715_v41 = vrot.slane %v1413_v34, 7  ;;  %v1960_v42 = vrot.slane %v1692_v35, 1  ;;  %v1957_v44 = vsel %vm895_vm1, %v1952_v18, %v1956_v31  ;;  %v1712_v52 = vsel %vm649_vm0, %v1707_v19, %v1711_v30 }
 0x325   :  { %v1959_v53 = vsel %vm895_vm1, %v1954_v8, %v1958_v9  ;;  %v1714_v54 = vsel %vm649_vm0, %v1709_v29, %v1713_v7  ;;  %v1970_v17 = vsel %vm895_vm1, %v1958_v9, 0.0 }
 0x326   :  { %v1961_v55 = vsel %vm895_vm1, %v1956_v31, %v1960_v42  ;;  %v1716_v56 = vsel %vm649_vm0, %v1711_v30, %v1715_v41  ;;  %v1971_v45 = vsel %vm895_vm1, %v1960_v42, 0.0 }
 0x358   :  { %v1921_v0 = vpop.f32.mrb[16].mxu1 }
 0x359   :  { %v1922_v1 = vadd.f32 %v1921_v0, %v1725_v62  ;;  %v1923_v2 = vpop.f32.mrb[17].mxu1 }
 0x35a   :  { %v1924_v21 = vadd.f32 %v1923_v2, %v1726_v57  ;;  %v1925_v3 = vpop.f32.mrb[18].mxu1 }
 0x35b   :  { %v1972_v63 = vadd.f32 %v1950_v22, %v1922_v1  ;;  %v1926_v59 = vadd.f32 %v1925_v3, %v1706_v24  ;;  %v1927_v50 = vpop.f32.mrb[19].mxu1 }
 0x35c   :  { %v1973_v4 = vadd.f32 %v1953_v25, %v1924_v21  ;;  %v1928_v5 = vadd.f32 %v1927_v50, %v1708_v26 }
 0x35d   :  { %v1974_v6 = vadd.f32 %v1955_v37, %v1926_v59  ;;  %v3156_v12 = vsel %vm2913_vm3, %v1972_v63, 0.0 }
 0x35e   :  { %v1975_v60 = vadd.f32 %v1957_v44, %v1928_v5  ;;  %v3164_v49 = vsel %vm2913_vm3, %v1973_v4, 0.0  ;;  %v2042_v19 = vmul.f32 %v3156_v12, %v3156_v12 }
 0x35f   :  { %v3152_v10 = vsel %vm2909_vm2, %v1974_v6, 0.0  ;;  %v2043_v26 = vmul.f32 %v3164_v49, %v3164_v49 }
 0x360   :  { %v3160_v61 = vsel %vm2909_vm2, %v1975_v60, 0.0  ;;  %v1931_v13 = vpop.f32.mrb[20].mxu1  ;;  %v2044_v14 = vmul.f32 %v3152_v10, %v3152_v10  ;;  %v1992_v27 = vadd.f32 %v3152_v10, %v3156_v12 }
 0x361   :  { %v1932_v47 = vadd.f32 %v1931_v13, %v1710_v39  ;;  %v1933_v16 = vpop.f32.mrb[21].mxu1  ;;  %v2045_v18 = vmul.f32 %v3160_v61, %v3160_v61  ;;  %v2001_v15 = vadd.f32 %v3160_v61, %v3164_v49 }
 0x362   :  { %v1934_v46 = vadd.f32 %v1933_v16, %v1712_v52  ;;  %v1935_v11 = vpop.f32.mrb[22].mxu1  ;;  %v2050_v8 = vadd.f32 %v2044_v14, %v2042_v19 }
 0x363   :  { %v1976_v22 = vadd.f32 %v1959_v53, %v1932_v47  ;;  %v1936_v24 = vadd.f32 %v1935_v11, %v1714_v54  ;;  %v1937_v25 = vpop.f32.mrb[23].mxu1  ;;  %v2059_v9 = vadd.f32 %v2045_v18, %v2043_v26 }
 0x364   :  { %v1977_v28 = vadd.f32 %v1961_v55, %v1934_v46  ;;  %v1938_v29 = vadd.f32 %v1937_v25, %v1716_v56 }
 0x365   :  { %v3182_v20 = vsel %vm2935_vm4, %v1976_v22, 0.0  ;;  %v1978_v30 = vadd.f32 %v1970_v17, %v1936_v24 }
 0x366   :  { %v1993_v31 = vadd.f32 %v1992_v27, %v3182_v20  ;;  %v2046_v32 = vmul.f32 %v3182_v20, %v3182_v20  ;;  %v3189_v33 = vsel %vm2935_vm4, %v1977_v28, 0.0  ;;  %v1979_v7 = vadd.f32 %v1971_v45, %v1938_v29 }
 0x367   :  { %v2002_v34 = vadd.f32 %v2001_v15, %v3189_v33  ;;  %v2047_v35 = vmul.f32 %v3189_v33, %v3189_v33  ;;  %v3196_v37 = vsel %vm2941_vm5, %v1978_v30, 0.0 }
 0x368   :  { %v2051_v39 = vadd.f32 %v2050_v8, %v2046_v32  ;;  %v1994_v41 = vadd.f32 %v1993_v31, %v3196_v37  ;;  %v2048_v42 = vmul.f32 %v3196_v37, %v3196_v37  ;;  %v3203_v44 = vsel %vm2941_vm5, %v1979_v7, 0.0 }
 0x369   :  { %v2060_v52 = vadd.f32 %v2059_v9, %v2047_v35  ;;  %v2003_v53 = vadd.f32 %v2002_v34, %v3203_v44  ;;  %v2049_v54 = vmul.f32 %v3203_v44, %v3203_v44 }
 0x36a   :  { %v1995_v55 = vrot.slane %v1994_v41, 4  ;;  %v2052_v56 = vadd.f32 %v2051_v39, %v2048_v42 }
 0x36b   :  { %v2004_v62 = vrot.slane %v2003_v53, 4  ;;  %v2061_v0 = vadd.f32 %v2060_v52, %v2049_v54 }
 0x36c   :  { %v1996_v1 = vadd.f32 %v1995_v55, %v1994_v41  ;;  %v2053_v57 = vrot.slane %v2052_v56, 4 }
 0x36d   :  { %v2005_v2 = vadd.f32 %v2004_v62, %v2003_v53  ;;  %v2062_v21 = vrot.slane %v2061_v0, 4 }
 0x36e   :  { %v1997_v3 = vrot.slane %v1996_v1, 2  ;;  %v2054_v50 = vadd.f32 %v2053_v57, %v2052_v56 }
 0x36f   :  { %v2006_v63 = vrot.slane %v2005_v2, 2  ;;  %v2063_v5 = vadd.f32 %v2062_v21, %v2061_v0 }
 0x370   :  { %v1998_v59 = vadd.f32 %v1997_v3, %v1996_v1  ;;  %v2055_v13 = vrot.slane %v2054_v50, 2 }
 0x371   :  { %v2007_v4 = vadd.f32 %v2006_v63, %v2005_v2  ;;  %v2064_v47 = vrot.slane %v2063_v5, 2 }
 0x372   :  { %v1999_v6 = vrot.slane %v1998_v59, 1  ;;  %v2056_v17 = vadd.f32 %v2055_v13, %v2054_v50 }
 0x373   :  { %v2008_v60 = vrot.slane %v2007_v4, 1  ;;  %v2065_v45 = vadd.f32 %v2064_v47, %v2063_v5 }
 0x374   :  { %v2000_v14 = vadd.f32 %v1999_v6, %v1998_v59  ;;  %v2057_v46 = vrot.slane %v2056_v17, 1 }
 0x375   :  { %v2009_v16 = vadd.f32 %v2008_v60, %v2007_v4  ;;  %v2066_v11 = vrot.slane %v2065_v45, 1 }
 0x376   :  { %2010 = vrot.lane.b32.xlu0 %v2000_v14, %s2809_s7  ;;  %v2058_v19 = vadd.f32 %v2057_v46, %v2056_v17 }
 0x377   :  { %2012 = vrot.lane.b32.xlu1 %v2009_v16, %s2809_s7  ;;  %v2067_v18 = vadd.f32 %v2066_v11, %v2065_v45 }
 0x37a   :  { %2018 = vrot.lane.b32.xlu0 %v2000_v14, %s2808_s6 }
 0x37b   :  { %2020 = vrot.lane.b32.xlu1 %v2009_v16, %s2808_s6 }
 0x37e   :  { %2026 = vrot.lane.b32.xlu0 %v2000_v14, %s2810_s8 }
 0x37f   :  { %2028 = vrot.lane.b32.xlu1 %v2009_v16, %s2810_s8 }
 0x382   :  { %2068 = vrot.lane.b32.xlu0 %v2058_v19, %s2809_s7 }
 0x383   :  { %2070 = vrot.lane.b32.xlu1 %v2067_v18, %s2809_s7 }
 0x386   :  { %2076 = vrot.lane.b32.xlu0 %v2058_v19, %s2808_s6 }
 0x387   :  { %2078 = vrot.lane.b32.xlu1 %v2067_v18, %s2808_s6 }
 0x38a   :  { %2084 = vrot.lane.b32.xlu0 %v2058_v19, %s2810_s8 }
 0x38b   :  { %2086 = vrot.lane.b32.xlu1 %v2067_v18, %s2810_s8 }
 0x3e8   :  { %v2011_v22 = vpop.permute.xlu0 %2010 }
 0x3e9   :  { %v2013_v24 = vpop.permute.xlu1 %2012 }
 0x3ea   :  { %v2014_v25 = vsel %vm963_vm6, %v2011_v22, %v2013_v24  ;;  %v2015_v26 = vsel %vm963_vm6, %v2013_v24, %v2011_v22 }
 0x3eb   :  { %v2016_v15 = vadd.f32 %v2015_v26, %v2000_v14  ;;  %v2017_v30 = vadd.f32 %v2014_v25, %v2009_v16 }
 0x3ec   :  { %v2019_v27 = vpop.permute.xlu0 %2018 }
 0x3ed   :  { %v2021_v28 = vpop.permute.xlu1 %2020 }
 0x3ee   :  { %v2022_v29 = vsel %vm972_vm7, %v2019_v27, %v2021_v28  ;;  %v2023_v8 = vsel %vm972_vm7, %v2021_v28, %v2019_v27 }
 0x3ef   :  { %v2024_v32 = vadd.f32 %v2023_v8, %v2016_v15  ;;  %v2025_v7 = vadd.f32 %v2022_v29, %v2017_v30 }
 0x3f0   :  { %v2027_v31 = vpop.permute.xlu0 %2026 }
 0x3f1   :  { %v2029_v9 = vpop.permute.xlu1 %2028 }
 0x3f2   :  { %v2030_v34 = vsel %vm981_vm8, %v2027_v31, %v2029_v9  ;;  %v2031_v35 = vsel %vm981_vm8, %v2029_v9, %v2027_v31 }
 0x3f3   :  { %v2032_v39 = vadd.f32 %v2031_v35, %v2024_v32  ;;  %v2033_v41 = vadd.f32 %v2030_v34, %v2025_v7 }
 0x3f4   :  { %v2069_v42 = vpop.permute.xlu0 %2068 }
 0x3f5   :  { %v2034_v52 = vadd.f32 %v2032_v39, %v2009_v16  ;;  %v2035_v53 = vadd.f32 %v2033_v41, %v2000_v14  ;;  %v2071_v54 = vpop.permute.xlu1 %2070  ;;  %v2432_v41 = vld [vmem:[%s3320_s2 + $0x2] ss:$4 sm:$0x3] }
 0x3f6   :  { %v2072_v55 = vsel %vm963_vm6, %v2069_v42, %v2071_v54  ;;  %v2073_v56 = vsel %vm963_vm6, %v2071_v54, %v2069_v42 }
 0x3f7   :  { %v2036_v0 = vadd.f32 %v2034_v52, %v2014_v25  ;;  %v2037_v1 = vadd.f32 %v2035_v53, %v2015_v26  ;;  %v2074_v3 = vadd.f32 %v2073_v56, %v2058_v19  ;;  %v2075_v63 = vadd.f32 %v2072_v55, %v2067_v18 }
 0x3f8   :  { %v2077_v62 = vpop.permute.xlu0 %2076 }
 0x3f9   :  { %v2079_v57 = vpop.permute.xlu1 %2078  ;;  %v2038_v50 = vadd.f32 %v2036_v0, %v2022_v29  ;;  %v2039_v4 = vadd.f32 %v2037_v1, %v2023_v8  ;;  %v2433_v1 = vld [vmem:[%s3320_s2 + $0x3] ss:$4 sm:$0x3] }
 0x3fa   :  { %v2080_v2 = vsel %vm972_vm7, %v2077_v62, %v2079_v57  ;;  %v2081_v21 = vsel %vm972_vm7, %v2079_v57, %v2077_v62 }
 0x3fb   :  { %v2082_v5 = vadd.f32 %v2081_v21, %v2074_v3  ;;  %v2083_v6 = vadd.f32 %v2080_v2, %v2075_v63  ;;  %v2040_v17 = vadd.f32 %v2038_v50, %v2030_v34  ;;  %v2041_v45 = vadd.f32 %v2039_v4, %v2031_v35  ;;  %v2778_v63 = vld [vmem:[%s3318_s0 + $0x8] sm:$0xff]  ;;  %v2779_v4 = vld [vmem:[%s3318_s0 + $0x10] sm:$0xff] }
 0x3fc   :  { %v2085_v59 = vpop.permute.xlu0 %2084  ;;  %v2166_v50 = vunpack.c.h.bf16 %v2778_v63 }
 0x3fd   :  { %v2087_v60 = vpop.permute.xlu1 %2086  ;;  %v2100_v25 = vmul.f32 0.0078125, %v2040_v17  ;;  %v2101_v26 = vmul.f32 0.0078125, %v2041_v45 }
 0x3fe   :  { %v2088_v13 = vsel %vm981_vm8, %v2085_v59, %v2087_v60  ;;  %v2089_v14 = vsel %vm981_vm8, %v2087_v60, %v2085_v59  ;;  %v2165_v59 = vunpack.c.l.bf16 %v2778_v63 }
 0x3ff   :  { %v2090_v47 = vadd.f32 %v2089_v14, %v2082_v5  ;;  %v2091_v16 = vadd.f32 %v2088_v13, %v2083_v6  ;;  %v2104_v15 = vmul.f32 %v2100_v25, %v2100_v25  ;;  %v2105_v30 = vmul.f32 %v2101_v26, %v2101_v26 }
 0x400   :  { %v2167_v5 = vunpack.c.l.bf16 %v2779_v4  ;;  %v2168_v6 = vunpack.c.h.bf16 %v2779_v4 }
 0x401   :  { %v2092_v46 = vadd.f32 %v2090_v47, %v2067_v18  ;;  %v2093_v11 = vadd.f32 %v2091_v16, %v2058_v19 }
 0x403   :  { %v2094_v22 = vadd.f32 %v2092_v46, %v2072_v55  ;;  %v2095_v24 = vadd.f32 %v2093_v11, %v2073_v56 }
 0x405   :  { %v2096_v27 = vadd.f32 %v2094_v22, %v2080_v2  ;;  %v2097_v28 = vadd.f32 %v2095_v24, %v2081_v21  ;;  %v2777_v2 = vld [vmem:[%s3318_s0] sm:$0xff] }
 0x406   :  { %v2163_v21 = vunpack.c.l.bf16 %v2777_v2  ;;  %v2164_v3 = vunpack.c.h.bf16 %v2777_v2 }
 0x407   :  { %v2098_v29 = vadd.f32 %v2096_v27, %v2088_v13  ;;  %v2099_v8 = vadd.f32 %v2097_v28, %v2089_v14 }
 0x409   :  { %v2102_v31 = vmul.f32 0.0078125, %v2098_v29  ;;  %v2103_v32 = vmul.f32 0.0078125, %v2099_v8 }
 0x40b   :  { %v2106_v23 = vsub.f32 %v2102_v31, %v2104_v15  ;;  %v2107_v7 = vsub.f32 %v2103_v32, %v2105_v30 }
 0x40d   :  { %v2108_v9 = vadd.f32 1e-05, %v2106_v23  ;;  %v2109_v39 = vadd.f32 1e-05, %v2107_v7 }
 0x40f   :  { %2773 = vrsqrt.f32 %v2108_v9 }
 0x410   :  { %2775 = vrsqrt.f32 %v2109_v39 }
 0x419   :  { %v2774_v18 = vpop.eup %2773 }
 0x41a   :  { %v2776_v19 = vpop.eup %2775 }
 0x41b   :  { %v2114_v34 = vcombine.low %v2774_v18, %v2776_v19 }
 0x41d   :  { %v2121_v35 = vrot.slane %v2114_v34, %v3056_v36 }
 0x41f   :  { %v2128_v42 = vrot.slane %v2121_v35, %v3056_v36 }
 0x421   :  { %v2130_v52 = vmul.f32 %v2432_v41, %v2128_v42 }
 0x423   :  { %v2135_v53 = vrot.slane %v2130_v52, %v3063_v43  ;;  %v2139_v54 = vrot.slane %v2130_v52, %v3067_v48 }
 0x425   :  { %v2142_v55 = vmul.f32 %v2135_v53, %v2100_v25  ;;  %v2143_v56 = vmul.f32 %v2139_v54, %v2101_v26  ;;  %v2171_v47 = vmul.f32 %v2135_v53, %v3156_v12  ;;  %v2172_v16 = vmul.f32 %v2139_v54, %v3164_v49 }
 0x426   :  { %v2173_v17 = vmul.f32 %v2135_v53, %v3152_v10  ;;  %v2174_v45 = vmul.f32 %v2139_v54, %v3160_v61  ;;  %v2175_v22 = vmul.f32 %v2135_v53, %v3182_v20  ;;  %v2176_v24 = vmul.f32 %v2139_v54, %v3189_v33 }
 0x427   :  { %v2146_v62 = vcombine.low %v2142_v55, %v2143_v56  ;;  %v2177_v25 = vmul.f32 %v2135_v53, %v3196_v37  ;;  %v2178_v26 = vmul.f32 %v2139_v54, %v3203_v44 }
 0x429   :  { %v2153_v0 = vrot.slane %v2146_v62, %v3056_v36 }
 0x42b   :  { %v2160_v57 = vrot.slane %v2153_v0, %v3056_v36  ;;  %v2780_v36 = vld [vmem:[%s3318_s0 + $0x18] sm:$0xff] }
 0x42c   :  { %v2169_v13 = vunpack.c.l.bf16 %v2780_v36  ;;  %v2170_v14 = vunpack.c.h.bf16 %v2780_v36 }
 0x42d   :  { %v2162_v60 = vsub.f32 %v2433_v1, %v2160_v57 }
 0x42f   :  { %v2183_v46 = vrot.slane %v2162_v60, %v3063_v43  ;;  %v2187_v11 = vrot.slane %v2162_v60, %v3067_v48 }
 0x431   :  { %v2190_v27 = vadd.f32 %v2183_v46, %v2171_v47  ;;  %v2191_v12 = vadd.f32 %v2187_v11, %v2172_v16  ;;  %v2192_v28 = vadd.f32 %v2183_v46, %v2173_v17  ;;  %v2193_v49 = vadd.f32 %v2187_v11, %v2174_v45 }
 0x432   :  { %v2194_v29 = vadd.f32 %v2183_v46, %v2175_v22  ;;  %v2195_v10 = vadd.f32 %v2187_v11, %v2176_v24  ;;  %v2196_v8 = vadd.f32 %v2183_v46, %v2177_v25  ;;  %v2197_v61 = vadd.f32 %v2187_v11, %v2178_v26 }
 0x433   :  { %v2198_v15 = vadd.f32 %v2190_v27, %v2163_v21  ;;  %v2199_v43 = vadd.f32 %v2191_v12, %v2164_v3  ;;  %v2200_v30 = vadd.f32 %v2192_v28, %v2165_v59  ;;  %v2201_v48 = vadd.f32 %v2193_v49, %v2166_v50 }
 0x434   :  { %v2202_v31 = vadd.f32 %v2194_v29, %v2167_v5  ;;  %v2203_v20 = vadd.f32 %v2195_v10, %v2168_v6  ;;  %v2204_v32 = vadd.f32 %v2196_v8, %v2169_v13  ;;  %v2205_v33 = vadd.f32 %v2197_v61, %v2170_v14 }
 0x435   :  { %v2206_v23 = vmax.f32 %v2198_v15, 0.0  ;;  %v2207_v37 = vmax.f32 %v2199_v43, 0.0  ;;  %v2208_v7 = vmax.f32 %v2200_v30, 0.0  ;;  %v2209_v44 = vmax.f32 %v2201_v48, 0.0 }
 0x436   :  { %v2210_v9 = vmax.f32 %v2202_v31, 0.0  ;;  %v2211_v39 = vmax.f32 %v2203_v20, 0.0  ;;  %v2212_v18 = vmax.f32 %v2204_v32, 0.0  ;;  %v2213_v19 = vmax.f32 %v2205_v33, 0.0 }
 0x437   :  { %v2214_v34 = vsel %vm2913_vm3, %v2206_v23, 0.0  ;;  %v2215_v35 = vsel %vm2913_vm3, %v2207_v37, 0.0  ;;  %v2216_v41 = vsel %vm2909_vm2, %v2208_v7, 0.0  ;;  %v2217_v42 = vsel %vm2909_vm2, %v2209_v44, 0.0 }
 0x438   :  { %v2218_v52 = vsel %vm2935_vm4, %v2210_v9, 0.0  ;;  %v2219_v53 = vsel %vm2935_vm4, %v2211_v39, 0.0  ;;  %v2220_v54 = vsel %vm2941_vm5, %v2212_v18, 0.0  ;;  %v2221_v55 = vsel %vm2941_vm5, %v2213_v19, 0.0  ;;  %2222 = vst [vmem:[%s3321_s3] sm:$0xff] %v2214_v34  ;;  %2223 = vst [vmem:[%s3321_s3 + $0x8] sm:$0xff] %v2215_v35 }
 0x439   :  { %2224 = vst [vmem:[%s3321_s3 + $0x10] sm:$0xff] %v2216_v41  ;;  %2225 = vst [vmem:[%s3321_s3 + $0x18] sm:$0xff] %v2217_v42 }
 0x43a   :  { %2226 = vst [vmem:[%s3321_s3 + $0x20] sm:$0xff] %v2218_v52  ;;  %2227 = vst [vmem:[%s3321_s3 + $0x28] sm:$0xff] %v2219_v53 }
 0x43b   :  { %2228 = vst [vmem:[%s3321_s3 + $0x30] sm:$0xff] %v2220_v54  ;;  %2229 = vst [vmem:[%s3321_s3 + $0x38] sm:$0xff] %v2221_v55 }
 0x43c   :  { %2234 = vsyncpa [#allocation4], 1 }

</bundles_post_ra>
